<compile_context>
chip_gen: v6e
topology: v6e:2x2x1
jax: 0.10.0
libtpu: 0.0.40
codegen_flags: <defaults>
</compile_context>

<pallas_src>
import functools

import jax
import jax.numpy as jnp
from jax.experimental import pallas as pl
from jax.experimental.pallas import tpu as pltpu


def _gelu_tanh(t):
    # tanh-approximate GELU.
    # TODO(synk): PyTorch nn.GELU() default is the exact erf form; erf has no
    # guaranteed Mosaic lowering, so the tanh approximation is used here (and
    # in the reference) — max deviation ~1e-3.
    return 0.5 * t * (1.0 + jnp.tanh(0.7978845608028654 *
                                     (t + 0.044715 * t * t * t)))


# ----------------------------------------------------------------------------
# Fused decoder kernel: one (batch_block, layer) pair per grid step.
# ----------------------------------------------------------------------------
def _dec_kernel(x_ref, mem_ref,
                sa_g_ref, sa_b_ref, wqkv_ref, wo_sa_ref, bo_sa_ref,
                ca_g_ref, ca_b_ref, wq_ref, wkv_ref, wo_ca_ref, bo_ca_ref,
                ff_g_ref, ff_b_ref, w1_ref, b1_ref, w2_ref, b2_ref,
                fn_g_ref, fn_b_ref,
                o_ref,
                x_scr, attn_scr,
                *, heads, dim_head, eps):
    l = pl.program_id(1)
    depth = pl.num_programs(1)
    inner = heads * dim_head
    scale = dim_head ** -0.5

    blk_b, n_q, d = x_ref.shape
    _, n_kv, _ = mem_ref.shape
    rows_q = blk_b * n_q
    rows_kv = blk_b * n_kv

    def layer_norm(t, g, b):
        mu = jnp.mean(t, axis=-1, keepdims=True)
        var = jnp.mean(jnp.square(t - mu), axis=-1, keepdims=True)
        return (t - mu) * jax.lax.rsqrt(var + eps) * g + b

    def softmax_last(s):
        s = s - jnp.max(s, axis=-1, keepdims=True)
        e = jnp.exp(s)
        return e * pl.reciprocal(jnp.sum(e, axis=-1, keepdims=True),
                                 approx=True)

    def bdot(a, b):
        # bf16 MXU operands, f32 accumulation.
        return jnp.dot(a.astype(jnp.bfloat16), b.astype(jnp.bfloat16),
                       preferred_element_type=jnp.float32)

    def mha(q_flat, k_flat, v_flat, nk, w_out, b_out):
        # Per-head attention (static unroll over heads). Each head's output is
        # written into its column slab of attn_scr so the output projection is
        # ONE K=inner matmul against the full w_out (no per-head K=dim_head
        # matmuls, no heads-wide VPU accumulate).
        q_flat = q_flat.astype(jnp.bfloat16)   # scale already folded into q
        k_flat = k_flat.astype(jnp.bfloat16)
        v_flat = v_flat.astype(jnp.bfloat16)
        for h in range(heads):
            sl = slice(h * dim_head, (h + 1) * dim_head)
            qh = q_flat[:, sl].reshape(blk_b, n_q, dim_head)
            kh = k_flat[:, sl].reshape(blk_b, nk, dim_head)
            vh = v_flat[:, sl].reshape(blk_b, nk, dim_head)
            # Contract the last dim of both operands -- no explicit .T.
            dots = jnp.einsum('bnd,bmd->bnm', qh, kh,
                              preferred_element_type=jnp.float32)
            attn = softmax_last(dots)            # dropout(p=0) = identity
            oh = jnp.einsum('bnm,bmd->bnd', attn.astype(jnp.bfloat16), vh,
                            preferred_element_type=jnp.float32)
            attn_scr[:, sl] = oh.reshape(rows_q, dim_head)
        return bdot(attn_scr[...], w_out) + b_out

    # Residual stream lives in VMEM scratch across the depth axis; the output
    # block is written exactly once (at the last layer) per batch block.
    @pl.when(l == 0)
    def _init():
        x_scr[...] = x_ref[...].reshape(rows_q, d)

    x = x_scr[...]                               # (rows, D) f32, row-dense

    # ---- SelfAttention(x) + x ---------------------------------------------
    xn = layer_norm(x, sa_g_ref[0], sa_b_ref[0])
    qkv = bdot(xn, wqkv_ref[0])                  # (rows, 3*inner) f32
    q = qkv[:, :inner] * scale                   # fold 1/sqrt(dh) into q
    k = qkv[:, inner:2 * inner]
    v = qkv[:, 2 * inner:]
    x = x + mha(q, k, v, n_q, wo_sa_ref[0], bo_sa_ref[0])

    # ---- CrossAttention(x, mem) + x   (mem is NOT layer-normed) ------------
    xn = layer_norm(x, ca_g_ref[0], ca_b_ref[0])
    q = bdot(xn, wq_ref[0]) * scale
    mem = mem_ref[...].reshape(rows_kv, d)
    kv = bdot(mem, wkv_ref[0])
    x = x + mha(q, kv[:, :inner], kv[:, inner:], n_kv,
                wo_ca_ref[0], bo_ca_ref[0])

    # ---- FeedForward(x) + x -------------------------------------------------
    xn = layer_norm(x, ff_g_ref[0], ff_b_ref[0])
    h1 = _gelu_tanh(bdot(xn, w1_ref[0]) + b1_ref[0])
    x = x + bdot(h1, w2_ref[0]) + b2_ref[0]

    x_scr[...] = x                               # carry residual to next layer

    # ---- final LayerNorm on the in-register value, single lane-dense store -
    @pl.when(l == depth - 1)
    def _finalize():
        xf = layer_norm(x, fn_g_ref[...], fn_b_ref[...])
        o_ref[...] = xf.reshape(blk_b, n_q, d)


# ----------------------------------------------------------------------------
# Wrapper
# ----------------------------------------------------------------------------
def transformer_dec(x, mem, params, *, heads, dim_head, block_b=None):
    B, N, D = x.shape
    Bm, M, Dm = mem.shape
    assert Bm == B and Dm == D
    depth = params["w_qkv"].shape[0]
    inner = heads * dim_head
    mlp_dim = params["w1"].shape[-1]

    # Flattened-row target ~512 (MXU fill / weight-stream amortization), but
    # keep at least 2 batch blocks when B >= 2 so the "parallel" batch axis
    # spans both v7x TensorCores.
    if block_b is None:
        block_b = min(B, max(1, 512 // N))
        if B >= 2:
            block_b = min(block_b, max(1, B // 2))
    while B % block_b:
        block_b -= 1

    grid = (B // block_b, depth)

    def xmap(bb, l):                 # x / mem / out: blocked over batch
        return (bb, 0, 0)

    def wmap(bb, l):                 # per-layer weights: streamed over depth
        return (l, 0, 0)

    def fmap(bb, l):                 # final-norm params: resident
        return (0, 0)

    kernel = functools.partial(_dec_kernel, heads=heads, dim_head=dim_head,
                               eps=1e-5)

    # Weight matrices are streamed as bf16 (halves HBM traffic & VMEM blocks);
    # LN params and biases stay f32 (added in f32).
    bf16 = jnp.bfloat16
    w_qkv = params["w_qkv"].astype(bf16)
    w_out_sa = params["w_out_sa"].astype(bf16)
    w_q = params["w_q"].astype(bf16)
    w_kv = params["w_kv"].astype(bf16)
    w_out_ca = params["w_out_ca"].astype(bf16)
    w1 = params["w1"].astype(bf16)
    w2 = params["w2"].astype(bf16)

    in_specs = [
        pl.BlockSpec((block_b, N, D), xmap),        # x
        pl.BlockSpec((block_b, M, D), xmap),        # mem
        pl.BlockSpec((1, 1, D), wmap),              # sa_gamma
        pl.BlockSpec((1, 1, D), wmap),              # sa_beta
        pl.BlockSpec((1, D, 3 * inner), wmap),      # w_qkv (bf16)
        pl.BlockSpec((1, inner, D), wmap),          # w_out_sa (bf16)
        pl.BlockSpec((1, 1, D), wmap),              # b_out_sa
        pl.BlockSpec((1, 1, D), wmap),              # ca_gamma
        pl.BlockSpec((1, 1, D), wmap),              # ca_beta
        pl.BlockSpec((1, D, inner), wmap),          # w_q (bf16)
        pl.BlockSpec((1, D, 2 * inner), wmap),      # w_kv (bf16)
        pl.BlockSpec((1, inner, D), wmap),          # w_out_ca (bf16)
        pl.BlockSpec((1, 1, D), wmap),              # b_out_ca
        pl.BlockSpec((1, 1, D), wmap),              # ff_gamma
        pl.BlockSpec((1, 1, D), wmap),              # ff_beta
        pl.BlockSpec((1, D, mlp_dim), wmap),        # w1 (bf16)
        pl.BlockSpec((1, 1, mlp_dim), wmap),        # b1
        pl.BlockSpec((1, mlp_dim, D), wmap),        # w2 (bf16)
        pl.BlockSpec((1, 1, D), wmap),              # b2
        pl.BlockSpec((1, D), fmap),                 # final gamma
        pl.BlockSpec((1, D), fmap),                 # final beta
    ]

    # VMEM budget: double-buffered activation/weight blocks + output + scratch,
    # clamped to [32 MiB, 64 MiB] so the setting is legal on v7x as well.
    act_bytes = (2 * block_b * N * D + block_b * M * D) * 4
    wt_bytes = (D * 3 * inner + 2 * inner * D + D * inner + D * 2 * inner
                + D * mlp_dim + mlp_dim * D) * 2
    vec_bytes = (10 * D + 2 * mlp_dim) * 4
    scr_bytes = (block_b * N * D + block_b * N * inner) * 4
    vmem_limit = 2 * (act_bytes + wt_bytes + vec_bytes) + scr_bytes + (8 << 20)
    vmem_limit = int(min(max(vmem_limit, 32 << 20), 64 << 20))

    return pl.pallas_call(
        kernel,
        out_shape=jax.ShapeDtypeStruct((B, N, D), jnp.float32),
        grid=grid,
        in_specs=in_specs,
        out_specs=pl.BlockSpec((block_b, N, D), xmap),
        scratch_shapes=[
            pltpu.VMEM((block_b * N, D), jnp.float32),      # residual stream
            pltpu.VMEM((block_b * N, inner), jnp.float32),  # attn-out slab
        ],
        compiler_params=pltpu.CompilerParams(
            dimension_semantics=("parallel", "arbitrary"),
            vmem_limit_bytes=vmem_limit),
    )(x, mem,
      params["sa_gamma"], params["sa_beta"], w_qkv, w_out_sa,
      params["b_out_sa"],
      params["ca_gamma"], params["ca_beta"], w_q, w_kv, w_out_ca,
      params["b_out_ca"],
      params["ff_gamma"], params["ff_beta"], w1, params["b1"],
      w2, params["b2"],
      params["f_gamma"], params["f_beta"])


# ----------------------------------------------------------------------------
# Pure-JAX reference (for correctness check).  mxu_dtype=bfloat16 mirrors the
# kernel's matmul-operand casts; float32 is the exact PyTorch-like semantics.
# ----------------------------------------------------------------------------
def reference(x, mem, params, *, heads, dim_head, eps=1e-5,
              mxu_dtype=jnp.float32):
    def mm(a, b):
        return jnp.dot(a.astype(mxu_dtype), b.astype(mxu_dtype),
                       preferred_element_type=jnp.float32)

    def ln(t, g, b):
        mu = t.mean(-1, keepdims=True)
        var = ((t - mu) ** 2).mean(-1, keepdims=True)
        return (t - mu) / jnp.sqrt(var + eps) * g + b

    def split_heads(t):
        bsz, n, _ = t.shape
        return t.reshape(bsz, n, heads, dim_head).transpose(0, 2, 1, 3)

    def attn(q, k, v):
        qs = (q * dim_head ** -0.5).astype(mxu_dtype)
        dots = jnp.einsum('bhnd,bhmd->bhnm', qs, k.astype(mxu_dtype),
                          preferred_element_type=jnp.float32)
        a = jax.nn.softmax(dots, axis=-1)
        o = jnp.einsum('bhnm,bhmd->bhnd', a.astype(mxu_dtype),
                       v.astype(mxu_dtype),
                       preferred_element_type=jnp.float32)
        bsz, h, n, dh = o.shape
        return o.transpose(0, 2, 1, 3).reshape(bsz, n, h * dh)

    depth = params["w_qkv"].shape[0]
    h = x
    for l in range(depth):
        xn = ln(h, params["sa_gamma"][l, 0], params["sa_beta"][l, 0])
        q, k, v = jnp.split(mm(xn, params["w_qkv"][l]), 3, axis=-1)
        o = attn(split_heads(q), split_heads(k), split_heads(v))
        h = h + mm(o, params["w_out_sa"][l]) + params["b_out_sa"][l, 0]

        xn = ln(h, params["ca_gamma"][l, 0], params["ca_beta"][l, 0])
        q = mm(xn, params["w_q"][l])
        k, v = jnp.split(mm(mem, params["w_kv"][l]), 2, axis=-1)
        o = attn(split_heads(q), split_heads(k), split_heads(v))
        h = h + mm(o, params["w_out_ca"][l]) + params["b_out_ca"][l, 0]

        xn = ln(h, params["ff_gamma"][l, 0], params["ff_beta"][l, 0])
        hh = _gelu_tanh(mm(xn, params["w1"][l]) + params["b1"][l, 0])
        h = h + mm(hh, params["w2"][l]) + params["b2"][l, 0]
    return ln(h, params["f_gamma"][0], params["f_beta"][0])


def init_params(key, *, depth, dim, heads, dim_head, mlp_dim):
    inner = heads * dim_head
    ks = iter(jax.random.split(key, 32))

    def w(shape, s=0.05):
        return s * jax.random.normal(next(ks), shape, jnp.float32)

    def g(shape):
        return 1.0 + 0.1 * jax.random.normal(next(ks), shape, jnp.float32)

    def b(shape):
        return 0.1 * jax.random.normal(next(ks), shape, jnp.float32)

    return {
        "sa_gamma": g((depth, 1, dim)), "sa_beta": b((depth, 1, dim)),
        "w_qkv": w((depth, dim, 3 * inner)),
        "w_out_sa": w((depth, inner, dim)), "b_out_sa": b((depth, 1, dim)),
        "ca_gamma": g((depth, 1, dim)), "ca_beta": b((depth, 1, dim)),
        "w_q": w((depth, dim, inner)), "w_kv": w((depth, dim, 2 * inner)),
        "w_out_ca": w((depth, inner, dim)), "b_out_ca": b((depth, 1, dim)),
        "ff_gamma": g((depth, 1, dim)), "ff_beta": b((depth, 1, dim)),
        "w1": w((depth, dim, mlp_dim)), "b1": b((depth, 1, mlp_dim)),
        "w2": w((depth, mlp_dim, dim)), "b2": b((depth, 1, dim)),
        "f_gamma": g((1, dim)), "f_beta": b((1, dim)),
    }


if __name__ == "__main__":
    # Small shapes consistent with the module.
    B, N, M, D = 2, 8, 16, 32
    depth, heads, dim_head, mlp_dim = 2, 4, 8, 64

    key = jax.random.PRNGKey(0)
    kx, km, kp = jax.random.split(key, 3)
    x = jax.random.normal(kx, (B, N, D), jnp.float32)
    mem = jax.random.normal(km, (B, M, D), jnp.float32)
    params = init_params(kp, depth=depth, dim=D, heads=heads,
                         dim_head=dim_head, mlp_dim=mlp_dim)

    out = transformer_dec(x, mem, params, heads=heads, dim_head=dim_head)
    out = jax.block_until_ready(out)
    assert out.shape == (B, N, D)

    # Tight check against a reference that mirrors the kernel's bf16 matmul
    # operands (differences: approx reciprocal in softmax, accumulation order).
    ref_bf16 = reference(x, mem, params, heads=heads, dim_head=dim_head,
                         mxu_dtype=jnp.bfloat16)
    err_b = float(jnp.max(jnp.abs(out - ref_bf16)))
    assert jnp.allclose(out, ref_bf16, rtol=2e-2, atol=2e-2), (
        "mismatch vs bf16-matched reference, max abs err %e" % err_b)

    # Loose sanity check against full-f32 semantics (bounds bf16 quantization).
    ref_f32 = reference(x, mem, params, heads=heads, dim_head=dim_head)
    err_f = float(jnp.max(jnp.abs(out - ref_f32)))
    assert jnp.allclose(out, ref_f32, rtol=1e-1, atol=1e-1), (
        "mismatch vs f32 reference, max abs err %e" % err_f)

    print("KERNEL_OK")
</pallas_src>

<mosaic_0001>
module attributes {stable_mosaic.version = 11 : i64} {
  func.func @_dec_kernel(%arg0: i32, %arg1: i32, %arg2: memref<1x8x32xf32, #tpu.memory_space<vmem>>, %arg3: memref<1x16x32xf32, #tpu.memory_space<vmem>>, %arg4: memref<1x1x32xf32, #tpu.memory_space<vmem>>, %arg5: memref<1x1x32xf32, #tpu.memory_space<vmem>>, %arg6: memref<1x32x96xbf16, #tpu.memory_space<vmem>>, %arg7: memref<1x32x32xbf16, #tpu.memory_space<vmem>>, %arg8: memref<1x1x32xf32, #tpu.memory_space<vmem>>, %arg9: memref<1x1x32xf32, #tpu.memory_space<vmem>>, %arg10: memref<1x1x32xf32, #tpu.memory_space<vmem>>, %arg11: memref<1x32x32xbf16, #tpu.memory_space<vmem>>, %arg12: memref<1x32x64xbf16, #tpu.memory_space<vmem>>, %arg13: memref<1x32x32xbf16, #tpu.memory_space<vmem>>, %arg14: memref<1x1x32xf32, #tpu.memory_space<vmem>>, %arg15: memref<1x1x32xf32, #tpu.memory_space<vmem>>, %arg16: memref<1x1x32xf32, #tpu.memory_space<vmem>>, %arg17: memref<1x32x64xbf16, #tpu.memory_space<vmem>>, %arg18: memref<1x1x64xf32, #tpu.memory_space<vmem>>, %arg19: memref<1x64x32xbf16, #tpu.memory_space<vmem>>, %arg20: memref<1x1x32xf32, #tpu.memory_space<vmem>>, %arg21: memref<1x32xf32, #tpu.memory_space<vmem>>, %arg22: memref<1x32xf32, #tpu.memory_space<vmem>>, %arg23: memref<1x8x32xf32, #tpu.memory_space<vmem>>, %arg24: memref<8x32xf32, #tpu.memory_space<vmem>>, %arg25: memref<8x32xf32, #tpu.memory_space<vmem>>) attributes {dimension_semantics = [#tpu.dimension_semantics<parallel>, #tpu.dimension_semantics<arbitrary>], iteration_bounds = array<i64: 2, 2>, scalar_prefetch = 0 : i64, scratch_operands = 2 : i64, tpu.core_type = #tpu.core_type<tc>, window_params = [{transform_indices = @transform_0, window_bounds = array<i64: 1, 8, 32>}, {transform_indices = @transform_1, window_bounds = array<i64: 1, 16, 32>}, {transform_indices = @transform_2, window_bounds = array<i64: 1, 1, 32>}, {transform_indices = @transform_3, window_bounds = array<i64: 1, 1, 32>}, {transform_indices = @transform_4, window_bounds = array<i64: 1, 32, 96>}, {transform_indices = @transform_5, window_bounds = array<i64: 1, 32, 32>}, {transform_indices = @transform_6, window_bounds = array<i64: 1, 1, 32>}, {transform_indices = @transform_7, window_bounds = array<i64: 1, 1, 32>}, {transform_indices = @transform_8, window_bounds = array<i64: 1, 1, 32>}, {transform_indices = @transform_9, window_bounds = array<i64: 1, 32, 32>}, {transform_indices = @transform_10, window_bounds = array<i64: 1, 32, 64>}, {transform_indices = @transform_11, window_bounds = array<i64: 1, 32, 32>}, {transform_indices = @transform_12, window_bounds = array<i64: 1, 1, 32>}, {transform_indices = @transform_13, window_bounds = array<i64: 1, 1, 32>}, {transform_indices = @transform_14, window_bounds = array<i64: 1, 1, 32>}, {transform_indices = @transform_15, window_bounds = array<i64: 1, 32, 64>}, {transform_indices = @transform_16, window_bounds = array<i64: 1, 1, 64>}, {transform_indices = @transform_17, window_bounds = array<i64: 1, 64, 32>}, {transform_indices = @transform_18, window_bounds = array<i64: 1, 1, 32>}, {pipeline_mode = #tpu.pipeline_mode<synchronous>, transform_indices = @transform_19, window_bounds = array<i64: 1, 32>}, {pipeline_mode = #tpu.pipeline_mode<synchronous>, transform_indices = @transform_20, window_bounds = array<i64: 1, 32>}, {transform_indices = @transform_21, window_bounds = array<i64: 1, 8, 32>}]} {
    %c0_i32 = arith.constant 0 : i32
    %0 = arith.cmpi eq, %arg1, %c0_i32 : i32
    %1 = arith.extui %0 : i1 to i32
    %c0_i32_0 = arith.constant 0 : i32
    %2 = arith.cmpi ne, %1, %c0_i32_0 : i32
    scf.if %2 {
      %c0_135 = arith.constant 0 : index
      %c0_136 = arith.constant 0 : index
      %c0_137 = arith.constant 0 : index
      %333 = vector.load %arg2[%c0_135, %c0_136, %c0_137] : memref<1x8x32xf32, #tpu.memory_space<vmem>>, vector<1x8x32xf32>
      %334 = vector.shape_cast %333 : vector<1x8x32xf32> to vector<8x32xf32>
      %c0_138 = arith.constant 0 : index
      %c0_139 = arith.constant 0 : index
      %335 = vector.load %arg24[%c0_138, %c0_139] : memref<8x32xf32, #tpu.memory_space<vmem>>, vector<8x32xf32>
      tpu.vector_store %arg24[%c0_138, %c0_139], %334 {strides = array<i32>} : memref<8x32xf32, #tpu.memory_space<vmem>>, vector<8x32xf32>,
    } else {
    }
    %c0 = arith.constant 0 : index
    %c0_1 = arith.constant 0 : index
    %3 = vector.load %arg24[%c0, %c0_1] : memref<8x32xf32, #tpu.memory_space<vmem>>, vector<8x32xf32>
    %c0_2 = arith.constant 0 : index
    %c0_3 = arith.constant 0 : index
    %c0_4 = arith.constant 0 : index
    %4 = vector.load %arg4[%c0_2, %c0_3, %c0_4] : memref<1x1x32xf32, #tpu.memory_space<vmem>>, vector<1x1x32xf32>
    %5 = vector.shape_cast %4 : vector<1x1x32xf32> to vector<1x32xf32>
    %c0_5 = arith.constant 0 : index
    %c0_6 = arith.constant 0 : index
    %c0_7 = arith.constant 0 : index
    %6 = vector.load %arg5[%c0_5, %c0_6, %c0_7] : memref<1x1x32xf32, #tpu.memory_space<vmem>>, vector<1x1x32xf32>
    %7 = vector.shape_cast %6 : vector<1x1x32xf32> to vector<1x32xf32>
    %cst = arith.constant dense<0.000000e+00> : vector<8xf32>
    %8 = vector.multi_reduction <add>, %3, %cst [1] : vector<8x32xf32> to vector<8xf32>
    %9 = vector.shape_cast %8 : vector<8xf32> to vector<8x1xf32>
    %cst_8 = arith.constant 3.200000e+01 : f32
    %10 = vector.broadcast %cst_8 : f32 to vector<8x1xf32>
    %11 = arith.divf %9, %10 : vector<8x1xf32>
    %12 = vector.broadcast %11 : vector<8x1xf32> to vector<8x32xf32>
    %13 = arith.subf %3, %12 : vector<8x32xf32>
    %14 = arith.mulf %13, %13 : vector<8x32xf32>
    %cst_9 = arith.constant dense<0.000000e+00> : vector<8xf32>
    %15 = vector.multi_reduction <add>, %14, %cst_9 [1] : vector<8x32xf32> to vector<8xf32>
    %16 = vector.shape_cast %15 : vector<8xf32> to vector<8x1xf32>
    %cst_10 = arith.constant 3.200000e+01 : f32
    %17 = vector.broadcast %cst_10 : f32 to vector<8x1xf32>
    %18 = arith.divf %16, %17 : vector<8x1xf32>
    %19 = vector.broadcast %11 : vector<8x1xf32> to vector<8x32xf32>
    %20 = arith.subf %3, %19 : vector<8x32xf32>
    %cst_11 = arith.constant 9.99999974E-6 : f32
    %21 = vector.broadcast %cst_11 : f32 to vector<8x1xf32>
    %22 = arith.addf %18, %21 : vector<8x1xf32>
    %23 = math.rsqrt %22 : vector<8x1xf32>
    %24 = vector.broadcast %23 : vector<8x1xf32> to vector<8x32xf32>
    %25 = arith.mulf %20, %24 : vector<8x32xf32>
    %26 = vector.broadcast %5 : vector<1x32xf32> to vector<8x32xf32>
    %27 = arith.mulf %25, %26 : vector<8x32xf32>
    %28 = vector.broadcast %7 : vector<1x32xf32> to vector<8x32xf32>
    %29 = arith.addf %27, %28 : vector<8x32xf32>
    %c0_12 = arith.constant 0 : index
    %c0_13 = arith.constant 0 : index
    %c0_14 = arith.constant 0 : index
    %30 = vector.load %arg6[%c0_12, %c0_13, %c0_14] : memref<1x32x96xbf16, #tpu.memory_space<vmem>>, vector<1x32x96xbf16>
    %31 = vector.shape_cast %30 : vector<1x32x96xbf16> to vector<32x96xbf16>
    %32 = arith.truncf %29 : vector<8x32xf32> to vector<8x32xbf16>
    %cst_15 = arith.constant dense<0.000000e+00> : vector<8x96xf32>
    %33 = tpu.matmul %32, %31, %cst_15 {dimension_numbers = #tpu.dot_dimension_numbers<[1], [0], [0], [1], [0, 0, 1, 1], [], []>} : vector<8x32xbf16>, vector<32x96xbf16>, vector<8x96xf32> -> vector<8x96xf32>
    %34 = vector.extract_strided_slice %33 {offsets = [0, 0], sizes = [8, 32], strides = [1, 1]} : vector<8x96xf32> to vector<8x32xf32>
    %cst_16 = arith.constant 0.353553385 : f32
    %35 = vector.broadcast %cst_16 : f32 to vector<8x32xf32>
    %36 = arith.mulf %34, %35 : vector<8x32xf32>
    %37 = vector.extract_strided_slice %33 {offsets = [0, 32], sizes = [8, 32], strides = [1, 1]} : vector<8x96xf32> to vector<8x32xf32>
    %38 = vector.extract_strided_slice %33 {offsets = [0, 64], sizes = [8, 32], strides = [1, 1]} : vector<8x96xf32> to vector<8x32xf32>
    %c0_17 = arith.constant 0 : index
    %c0_18 = arith.constant 0 : index
    %c0_19 = arith.constant 0 : index
    %39 = vector.load %arg7[%c0_17, %c0_18, %c0_19] : memref<1x32x32xbf16, #tpu.memory_space<vmem>>, vector<1x32x32xbf16>
    %40 = vector.shape_cast %39 : vector<1x32x32xbf16> to vector<32x32xbf16>
    %c0_20 = arith.constant 0 : index
    %c0_21 = arith.constant 0 : index
    %c0_22 = arith.constant 0 : index
    %41 = vector.load %arg8[%c0_20, %c0_21, %c0_22] : memref<1x1x32xf32, #tpu.memory_space<vmem>>, vector<1x1x32xf32>
    %42 = vector.shape_cast %41 : vector<1x1x32xf32> to vector<1x32xf32>
    %43 = arith.truncf %36 : vector<8x32xf32> to vector<8x32xbf16>
    %44 = arith.truncf %37 : vector<8x32xf32> to vector<8x32xbf16>
    %45 = arith.truncf %38 : vector<8x32xf32> to vector<8x32xbf16>
    %46 = vector.extract_strided_slice %43 {offsets = [0, 0], sizes = [8, 8], strides = [1, 1]} : vector<8x32xbf16> to vector<8x8xbf16>
    %47 = vector.shape_cast %46 : vector<8x8xbf16> to vector<1x8x8xbf16>
    %48 = vector.extract_strided_slice %44 {offsets = [0, 0], sizes = [8, 8], strides = [1, 1]} : vector<8x32xbf16> to vector<8x8xbf16>
    %49 = vector.shape_cast %48 : vector<8x8xbf16> to vector<1x8x8xbf16>
    %50 = vector.extract_strided_slice %45 {offsets = [0, 0], sizes = [8, 8], strides = [1, 1]} : vector<8x32xbf16> to vector<8x8xbf16>
    %51 = vector.shape_cast %50 : vector<8x8xbf16> to vector<1x8x8xbf16>
    "tpu.trace_start"() <{level = 10 : i32, message = "bnd,bmd->bnm"}> : () -> ()
    %cst_23 = arith.constant dense<0.000000e+00> : vector<1x8x8xf32>
    %52 = tpu.matmul %47, %49, %cst_23 {dimension_numbers = #tpu.dot_dimension_numbers<[2], [2], [1], [1], [0, 0, 0, 1, 1, 1], [0], [0]>} : vector<1x8x8xbf16>, vector<1x8x8xbf16>, vector<1x8x8xf32> -> vector<1x8x8xf32>
    "tpu.trace_stop"() : () -> ()
    %cst_24 = arith.constant dense<0xFF800000> : vector<1x8xf32>
    %53 = vector.multi_reduction <maximumf>, %52, %cst_24 [2] : vector<1x8x8xf32> to vector<1x8xf32>
    %54 = vector.shape_cast %53 : vector<1x8xf32> to vector<1x8x1xf32>
    %55 = vector.broadcast %54 : vector<1x8x1xf32> to vector<1x8x8xf32>
    %56 = arith.subf %52, %55 : vector<1x8x8xf32>
    %57 = math.exp %56 : vector<1x8x8xf32>
    %cst_25 = arith.constant dense<0.000000e+00> : vector<1x8xf32>
    %58 = vector.multi_reduction <add>, %57, %cst_25 [2] : vector<1x8x8xf32> to vector<1x8xf32>
    %59 = vector.shape_cast %58 : vector<1x8xf32> to vector<1x8x1xf32>
    %60 = tpu.reciprocal %59 {approx = true} : vector<1x8x1xf32> -> vector<1x8x1xf32>
    %61 = vector.broadcast %60 : vector<1x8x1xf32> to vector<1x8x8xf32>
    %62 = arith.mulf %57, %61 : vector<1x8x8xf32>
    %63 = arith.truncf %62 : vector<1x8x8xf32> to vector<1x8x8xbf16>
    "tpu.trace_start"() <{level = 10 : i32, message = "bnm,bmd->bnd"}> : () -> ()
    %cst_26 = arith.constant dense<0.000000e+00> : vector<1x8x8xf32>
    %64 = tpu.matmul %63, %51, %cst_26 {dimension_numbers = #tpu.dot_dimension_numbers<[2], [1], [1], [2], [0, 0, 0, 1, 1, 2], [0], [0]>} : vector<1x8x8xbf16>, vector<1x8x8xbf16>, vector<1x8x8xf32> -> vector<1x8x8xf32>
    "tpu.trace_stop"() : () -> ()
    %65 = vector.shape_cast %64 : vector<1x8x8xf32> to vector<8x8xf32>
    %c0_27 = arith.constant 0 : index
    %c0_28 = arith.constant 0 : index
    %66 = vector.load %arg25[%c0_27, %c0_28] : memref<8x32xf32, #tpu.memory_space<vmem>>, vector<8x8xf32>
    tpu.vector_store %arg25[%c0_27, %c0_28], %65 {strides = array<i32>} : memref<8x32xf32, #tpu.memory_space<vmem>>, vector<8x8xf32>,
    %67 = vector.extract_strided_slice %43 {offsets = [0, 8], sizes = [8, 8], strides = [1, 1]} : vector<8x32xbf16> to vector<8x8xbf16>
    %68 = vector.shape_cast %67 : vector<8x8xbf16> to vector<1x8x8xbf16>
    %69 = vector.extract_strided_slice %44 {offsets = [0, 8], sizes = [8, 8], strides = [1, 1]} : vector<8x32xbf16> to vector<8x8xbf16>
    %70 = vector.shape_cast %69 : vector<8x8xbf16> to vector<1x8x8xbf16>
    %71 = vector.extract_strided_slice %45 {offsets = [0, 8], sizes = [8, 8], strides = [1, 1]} : vector<8x32xbf16> to vector<8x8xbf16>
    %72 = vector.shape_cast %71 : vector<8x8xbf16> to vector<1x8x8xbf16>
    "tpu.trace_start"() <{level = 10 : i32, message = "bnd,bmd->bnm"}> : () -> ()
    %cst_29 = arith.constant dense<0.000000e+00> : vector<1x8x8xf32>
    %73 = tpu.matmul %68, %70, %cst_29 {dimension_numbers = #tpu.dot_dimension_numbers<[2], [2], [1], [1], [0, 0, 0, 1, 1, 1], [0], [0]>} : vector<1x8x8xbf16>, vector<1x8x8xbf16>, vector<1x8x8xf32> -> vector<1x8x8xf32>
    "tpu.trace_stop"() : () -> ()
    %cst_30 = arith.constant dense<0xFF800000> : vector<1x8xf32>
    %74 = vector.multi_reduction <maximumf>, %73, %cst_30 [2] : vector<1x8x8xf32> to vector<1x8xf32>
    %75 = vector.shape_cast %74 : vector<1x8xf32> to vector<1x8x1xf32>
    %76 = vector.broadcast %75 : vector<1x8x1xf32> to vector<1x8x8xf32>
    %77 = arith.subf %73, %76 : vector<1x8x8xf32>
    %78 = math.exp %77 : vector<1x8x8xf32>
    %cst_31 = arith.constant dense<0.000000e+00> : vector<1x8xf32>
    %79 = vector.multi_reduction <add>, %78, %cst_31 [2] : vector<1x8x8xf32> to vector<1x8xf32>
    %80 = vector.shape_cast %79 : vector<1x8xf32> to vector<1x8x1xf32>
    %81 = tpu.reciprocal %80 {approx = true} : vector<1x8x1xf32> -> vector<1x8x1xf32>
    %82 = vector.broadcast %81 : vector<1x8x1xf32> to vector<1x8x8xf32>
    %83 = arith.mulf %78, %82 : vector<1x8x8xf32>
    %84 = arith.truncf %83 : vector<1x8x8xf32> to vector<1x8x8xbf16>
    "tpu.trace_start"() <{level = 10 : i32, message = "bnm,bmd->bnd"}> : () -> ()
    %cst_32 = arith.constant dense<0.000000e+00> : vector<1x8x8xf32>
    %85 = tpu.matmul %84, %72, %cst_32 {dimension_numbers = #tpu.dot_dimension_numbers<[2], [1], [1], [2], [0, 0, 0, 1, 1, 2], [0], [0]>} : vector<1x8x8xbf16>, vector<1x8x8xbf16>, vector<1x8x8xf32> -> vector<1x8x8xf32>
    "tpu.trace_stop"() : () -> ()
    %86 = vector.shape_cast %85 : vector<1x8x8xf32> to vector<8x8xf32>
    %c0_33 = arith.constant 0 : index
    %c8 = arith.constant 8 : index
    %87 = vector.load %arg25[%c0_33, %c8] : memref<8x32xf32, #tpu.memory_space<vmem>>, vector<8x8xf32>
    tpu.vector_store %arg25[%c0_33, %c8], %86 {strides = array<i32>} : memref<8x32xf32, #tpu.memory_space<vmem>>, vector<8x8xf32>,
    %88 = vector.extract_strided_slice %43 {offsets = [0, 16], sizes = [8, 8], strides = [1, 1]} : vector<8x32xbf16> to vector<8x8xbf16>
    %89 = vector.shape_cast %88 : vector<8x8xbf16> to vector<1x8x8xbf16>
    %90 = vector.extract_strided_slice %44 {offsets = [0, 16], sizes = [8, 8], strides = [1, 1]} : vector<8x32xbf16> to vector<8x8xbf16>
    %91 = vector.shape_cast %90 : vector<8x8xbf16> to vector<1x8x8xbf16>
    %92 = vector.extract_strided_slice %45 {offsets = [0, 16], sizes = [8, 8], strides = [1, 1]} : vector<8x32xbf16> to vector<8x8xbf16>
    %93 = vector.shape_cast %92 : vector<8x8xbf16> to vector<1x8x8xbf16>
    "tpu.trace_start"() <{level = 10 : i32, message = "bnd,bmd->bnm"}> : () -> ()
    %cst_34 = arith.constant dense<0.000000e+00> : vector<1x8x8xf32>
    %94 = tpu.matmul %89, %91, %cst_34 {dimension_numbers = #tpu.dot_dimension_numbers<[2], [2], [1], [1], [0, 0, 0, 1, 1, 1], [0], [0]>} : vector<1x8x8xbf16>, vector<1x8x8xbf16>, vector<1x8x8xf32> -> vector<1x8x8xf32>
    "tpu.trace_stop"() : () -> ()
    %cst_35 = arith.constant dense<0xFF800000> : vector<1x8xf32>
    %95 = vector.multi_reduction <maximumf>, %94, %cst_35 [2] : vector<1x8x8xf32> to vector<1x8xf32>
    %96 = vector.shape_cast %95 : vector<1x8xf32> to vector<1x8x1xf32>
    %97 = vector.broadcast %96 : vector<1x8x1xf32> to vector<1x8x8xf32>
    %98 = arith.subf %94, %97 : vector<1x8x8xf32>
    %99 = math.exp %98 : vector<1x8x8xf32>
    %cst_36 = arith.constant dense<0.000000e+00> : vector<1x8xf32>
    %100 = vector.multi_reduction <add>, %99, %cst_36 [2] : vector<1x8x8xf32> to vector<1x8xf32>
    %101 = vector.shape_cast %100 : vector<1x8xf32> to vector<1x8x1xf32>
    %102 = tpu.reciprocal %101 {approx = true} : vector<1x8x1xf32> -> vector<1x8x1xf32>
    %103 = vector.broadcast %102 : vector<1x8x1xf32> to vector<1x8x8xf32>
    %104 = arith.mulf %99, %103 : vector<1x8x8xf32>
    %105 = arith.truncf %104 : vector<1x8x8xf32> to vector<1x8x8xbf16>
    "tpu.trace_start"() <{level = 10 : i32, message = "bnm,bmd->bnd"}> : () -> ()
    %cst_37 = arith.constant dense<0.000000e+00> : vector<1x8x8xf32>
    %106 = tpu.matmul %105, %93, %cst_37 {dimension_numbers = #tpu.dot_dimension_numbers<[2], [1], [1], [2], [0, 0, 0, 1, 1, 2], [0], [0]>} : vector<1x8x8xbf16>, vector<1x8x8xbf16>, vector<1x8x8xf32> -> vector<1x8x8xf32>
    "tpu.trace_stop"() : () -> ()
    %107 = vector.shape_cast %106 : vector<1x8x8xf32> to vector<8x8xf32>
    %c0_38 = arith.constant 0 : index
    %c16 = arith.constant 16 : index
    %108 = vector.load %arg25[%c0_38, %c16] : memref<8x32xf32, #tpu.memory_space<vmem>>, vector<8x8xf32>
    tpu.vector_store %arg25[%c0_38, %c16], %107 {strides = array<i32>} : memref<8x32xf32, #tpu.memory_space<vmem>>, vector<8x8xf32>,
    %109 = vector.extract_strided_slice %43 {offsets = [0, 24], sizes = [8, 8], strides = [1, 1]} : vector<8x32xbf16> to vector<8x8xbf16>
    %110 = vector.shape_cast %109 : vector<8x8xbf16> to vector<1x8x8xbf16>
    %111 = vector.extract_strided_slice %44 {offsets = [0, 24], sizes = [8, 8], strides = [1, 1]} : vector<8x32xbf16> to vector<8x8xbf16>
    %112 = vector.shape_cast %111 : vector<8x8xbf16> to vector<1x8x8xbf16>
    %113 = vector.extract_strided_slice %45 {offsets = [0, 24], sizes = [8, 8], strides = [1, 1]} : vector<8x32xbf16> to vector<8x8xbf16>
    %114 = vector.shape_cast %113 : vector<8x8xbf16> to vector<1x8x8xbf16>
    "tpu.trace_start"() <{level = 10 : i32, message = "bnd,bmd->bnm"}> : () -> ()
    %cst_39 = arith.constant dense<0.000000e+00> : vector<1x8x8xf32>
    %115 = tpu.matmul %110, %112, %cst_39 {dimension_numbers = #tpu.dot_dimension_numbers<[2], [2], [1], [1], [0, 0, 0, 1, 1, 1], [0], [0]>} : vector<1x8x8xbf16>, vector<1x8x8xbf16>, vector<1x8x8xf32> -> vector<1x8x8xf32>
    "tpu.trace_stop"() : () -> ()
    %cst_40 = arith.constant dense<0xFF800000> : vector<1x8xf32>
    %116 = vector.multi_reduction <maximumf>, %115, %cst_40 [2] : vector<1x8x8xf32> to vector<1x8xf32>
    %117 = vector.shape_cast %116 : vector<1x8xf32> to vector<1x8x1xf32>
    %118 = vector.broadcast %117 : vector<1x8x1xf32> to vector<1x8x8xf32>
    %119 = arith.subf %115, %118 : vector<1x8x8xf32>
    %120 = math.exp %119 : vector<1x8x8xf32>
    %cst_41 = arith.constant dense<0.000000e+00> : vector<1x8xf32>
    %121 = vector.multi_reduction <add>, %120, %cst_41 [2] : vector<1x8x8xf32> to vector<1x8xf32>
    %122 = vector.shape_cast %121 : vector<1x8xf32> to vector<1x8x1xf32>
    %123 = tpu.reciprocal %122 {approx = true} : vector<1x8x1xf32> -> vector<1x8x1xf32>
    %124 = vector.broadcast %123 : vector<1x8x1xf32> to vector<1x8x8xf32>
    %125 = arith.mulf %120, %124 : vector<1x8x8xf32>
    %126 = arith.truncf %125 : vector<1x8x8xf32> to vector<1x8x8xbf16>
    "tpu.trace_start"() <{level = 10 : i32, message = "bnm,bmd->bnd"}> : () -> ()
    %cst_42 = arith.constant dense<0.000000e+00> : vector<1x8x8xf32>
    %127 = tpu.matmul %126, %114, %cst_42 {dimension_numbers = #tpu.dot_dimension_numbers<[2], [1], [1], [2], [0, 0, 0, 1, 1, 2], [0], [0]>} : vector<1x8x8xbf16>, vector<1x8x8xbf16>, vector<1x8x8xf32> -> vector<1x8x8xf32>
    "tpu.trace_stop"() : () -> ()
    %128 = vector.shape_cast %127 : vector<1x8x8xf32> to vector<8x8xf32>
    %c0_43 = arith.constant 0 : index
    %c24 = arith.constant 24 : index
    %129 = vector.load %arg25[%c0_43, %c24] : memref<8x32xf32, #tpu.memory_space<vmem>>, vector<8x8xf32>
    tpu.vector_store %arg25[%c0_43, %c24], %128 {strides = array<i32>} : memref<8x32xf32, #tpu.memory_space<vmem>>, vector<8x8xf32>,
    %c0_44 = arith.constant 0 : index
    %c0_45 = arith.constant 0 : index
    %130 = vector.load %arg25[%c0_44, %c0_45] : memref<8x32xf32, #tpu.memory_space<vmem>>, vector<8x32xf32>
    %131 = arith.truncf %130 : vector<8x32xf32> to vector<8x32xbf16>
    %cst_46 = arith.constant dense<0.000000e+00> : vector<8x32xf32>
    %132 = tpu.matmul %131, %40, %cst_46 {dimension_numbers = #tpu.dot_dimension_numbers<[1], [0], [0], [1], [0, 0, 1, 1], [], []>} : vector<8x32xbf16>, vector<32x32xbf16>, vector<8x32xf32> -> vector<8x32xf32>
    %133 = vector.broadcast %42 : vector<1x32xf32> to vector<8x32xf32>
    %134 = arith.addf %132, %133 : vector<8x32xf32>
    %135 = arith.addf %3, %134 : vector<8x32xf32>
    %c0_47 = arith.constant 0 : index
    %c0_48 = arith.constant 0 : index
    %c0_49 = arith.constant 0 : index
    %136 = vector.load %arg9[%c0_47, %c0_48, %c0_49] : memref<1x1x32xf32, #tpu.memory_space<vmem>>, vector<1x1x32xf32>
    %137 = vector.shape_cast %136 : vector<1x1x32xf32> to vector<1x32xf32>
    %c0_50 = arith.constant 0 : index
    %c0_51 = arith.constant 0 : index
    %c0_52 = arith.constant 0 : index
    %138 = vector.load %arg10[%c0_50, %c0_51, %c0_52] : memref<1x1x32xf32, #tpu.memory_space<vmem>>, vector<1x1x32xf32>
    %139 = vector.shape_cast %138 : vector<1x1x32xf32> to vector<1x32xf32>
    %cst_53 = arith.constant dense<0.000000e+00> : vector<8xf32>
    %140 = vector.multi_reduction <add>, %135, %cst_53 [1] : vector<8x32xf32> to vector<8xf32>
    %141 = vector.shape_cast %140 : vector<8xf32> to vector<8x1xf32>
    %cst_54 = arith.constant 3.200000e+01 : f32
    %142 = vector.broadcast %cst_54 : f32 to vector<8x1xf32>
    %143 = arith.divf %141, %142 : vector<8x1xf32>
    %144 = vector.broadcast %143 : vector<8x1xf32> to vector<8x32xf32>
    %145 = arith.subf %135, %144 : vector<8x32xf32>
    %146 = arith.mulf %145, %145 : vector<8x32xf32>
    %cst_55 = arith.constant dense<0.000000e+00> : vector<8xf32>
    %147 = vector.multi_reduction <add>, %146, %cst_55 [1] : vector<8x32xf32> to vector<8xf32>
    %148 = vector.shape_cast %147 : vector<8xf32> to vector<8x1xf32>
    %cst_56 = arith.constant 3.200000e+01 : f32
    %149 = vector.broadcast %cst_56 : f32 to vector<8x1xf32>
    %150 = arith.divf %148, %149 : vector<8x1xf32>
    %151 = vector.broadcast %143 : vector<8x1xf32> to vector<8x32xf32>
    %152 = arith.subf %135, %151 : vector<8x32xf32>
    %cst_57 = arith.constant 9.99999974E-6 : f32
    %153 = vector.broadcast %cst_57 : f32 to vector<8x1xf32>
    %154 = arith.addf %150, %153 : vector<8x1xf32>
    %155 = math.rsqrt %154 : vector<8x1xf32>
    %156 = vector.broadcast %155 : vector<8x1xf32> to vector<8x32xf32>
    %157 = arith.mulf %152, %156 : vector<8x32xf32>
    %158 = vector.broadcast %137 : vector<1x32xf32> to vector<8x32xf32>
    %159 = arith.mulf %157, %158 : vector<8x32xf32>
    %160 = vector.broadcast %139 : vector<1x32xf32> to vector<8x32xf32>
    %161 = arith.addf %159, %160 : vector<8x32xf32>
    %c0_58 = arith.constant 0 : index
    %c0_59 = arith.constant 0 : index
    %c0_60 = arith.constant 0 : index
    %162 = vector.load %arg11[%c0_58, %c0_59, %c0_60] : memref<1x32x32xbf16, #tpu.memory_space<vmem>>, vector<1x32x32xbf16>
    %163 = vector.shape_cast %162 : vector<1x32x32xbf16> to vector<32x32xbf16>
    %164 = arith.truncf %161 : vector<8x32xf32> to vector<8x32xbf16>
    %cst_61 = arith.constant dense<0.000000e+00> : vector<8x32xf32>
    %165 = tpu.matmul %164, %163, %cst_61 {dimension_numbers = #tpu.dot_dimension_numbers<[1], [0], [0], [1], [0, 0, 1, 1], [], []>} : vector<8x32xbf16>, vector<32x32xbf16>, vector<8x32xf32> -> vector<8x32xf32>
    %cst_62 = arith.constant 0.353553385 : f32
    %166 = vector.broadcast %cst_62 : f32 to vector<8x32xf32>
    %167 = arith.mulf %165, %166 : vector<8x32xf32>
    %c0_63 = arith.constant 0 : index
    %c0_64 = arith.constant 0 : index
    %c0_65 = arith.constant 0 : index
    %168 = vector.load %arg3[%c0_63, %c0_64, %c0_65] : memref<1x16x32xf32, #tpu.memory_space<vmem>>, vector<1x16x32xf32>
    %169 = vector.shape_cast %168 : vector<1x16x32xf32> to vector<16x32xf32>
    %c0_66 = arith.constant 0 : index
    %c0_67 = arith.constant 0 : index
    %c0_68 = arith.constant 0 : index
    %170 = vector.load %arg12[%c0_66, %c0_67, %c0_68] : memref<1x32x64xbf16, #tpu.memory_space<vmem>>, vector<1x32x64xbf16>
    %171 = vector.shape_cast %170 : vector<1x32x64xbf16> to vector<32x64xbf16>
    %172 = arith.truncf %169 : vector<16x32xf32> to vector<16x32xbf16>
    %cst_69 = arith.constant dense<0.000000e+00> : vector<16x64xf32>
    %173 = tpu.matmul %172, %171, %cst_69 {dimension_numbers = #tpu.dot_dimension_numbers<[1], [0], [0], [1], [0, 0, 1, 1], [], []>} : vector<16x32xbf16>, vector<32x64xbf16>, vector<16x64xf32> -> vector<16x64xf32>
    %174 = vector.extract_strided_slice %173 {offsets = [0, 0], sizes = [16, 32], strides = [1, 1]} : vector<16x64xf32> to vector<16x32xf32>
    %175 = vector.extract_strided_slice %173 {offsets = [0, 32], sizes = [16, 32], strides = [1, 1]} : vector<16x64xf32> to vector<16x32xf32>
    %c0_70 = arith.constant 0 : index
    %c0_71 = arith.constant 0 : index
    %c0_72 = arith.constant 0 : index
    %176 = vector.load %arg13[%c0_70, %c0_71, %c0_72] : memref<1x32x32xbf16, #tpu.memory_space<vmem>>, vector<1x32x32xbf16>
    %177 = vector.shape_cast %176 : vector<1x32x32xbf16> to vector<32x32xbf16>
    %c0_73 = arith.constant 0 : index
    %c0_74 = arith.constant 0 : index
    %c0_75 = arith.constant 0 : index
    %178 = vector.load %arg14[%c0_73, %c0_74, %c0_75] : memref<1x1x32xf32, #tpu.memory_space<vmem>>, vector<1x1x32xf32>
    %179 = vector.shape_cast %178 : vector<1x1x32xf32> to vector<1x32xf32>
    %180 = arith.truncf %167 : vector<8x32xf32> to vector<8x32xbf16>
    %181 = arith.truncf %174 : vector<16x32xf32> to vector<16x32xbf16>
    %182 = arith.truncf %175 : vector<16x32xf32> to vector<16x32xbf16>
    %183 = vector.extract_strided_slice %180 {offsets = [0, 0], sizes = [8, 8], strides = [1, 1]} : vector<8x32xbf16> to vector<8x8xbf16>
    %184 = vector.shape_cast %183 : vector<8x8xbf16> to vector<1x8x8xbf16>
    %185 = vector.extract_strided_slice %181 {offsets = [0, 0], sizes = [16, 8], strides = [1, 1]} : vector<16x32xbf16> to vector<16x8xbf16>
    %186 = vector.shape_cast %185 : vector<16x8xbf16> to vector<1x16x8xbf16>
    %187 = vector.extract_strided_slice %182 {offsets = [0, 0], sizes = [16, 8], strides = [1, 1]} : vector<16x32xbf16> to vector<16x8xbf16>
    %188 = vector.shape_cast %187 : vector<16x8xbf16> to vector<1x16x8xbf16>
    "tpu.trace_start"() <{level = 10 : i32, message = "bnd,bmd->bnm"}> : () -> ()
    %cst_76 = arith.constant dense<0.000000e+00> : vector<1x8x16xf32>
    %189 = tpu.matmul %184, %186, %cst_76 {dimension_numbers = #tpu.dot_dimension_numbers<[2], [2], [1], [1], [0, 0, 0, 1, 1, 1], [0], [0]>} : vector<1x8x8xbf16>, vector<1x16x8xbf16>, vector<1x8x16xf32> -> vector<1x8x16xf32>
    "tpu.trace_stop"() : () -> ()
    %cst_77 = arith.constant dense<0xFF800000> : vector<1x8xf32>
    %190 = vector.multi_reduction <maximumf>, %189, %cst_77 [2] : vector<1x8x16xf32> to vector<1x8xf32>
    %191 = vector.shape_cast %190 : vector<1x8xf32> to vector<1x8x1xf32>
    %192 = vector.broadcast %191 : vector<1x8x1xf32> to vector<1x8x16xf32>
    %193 = arith.subf %189, %192 : vector<1x8x16xf32>
    %194 = math.exp %193 : vector<1x8x16xf32>
    %cst_78 = arith.constant dense<0.000000e+00> : vector<1x8xf32>
    %195 = vector.multi_reduction <add>, %194, %cst_78 [2] : vector<1x8x16xf32> to vector<1x8xf32>
    %196 = vector.shape_cast %195 : vector<1x8xf32> to vector<1x8x1xf32>
    %197 = tpu.reciprocal %196 {approx = true} : vector<1x8x1xf32> -> vector<1x8x1xf32>
    %198 = vector.broadcast %197 : vector<1x8x1xf32> to vector<1x8x16xf32>
    %199 = arith.mulf %194, %198 : vector<1x8x16xf32>
    %200 = arith.truncf %199 : vector<1x8x16xf32> to vector<1x8x16xbf16>
    "tpu.trace_start"() <{level = 10 : i32, message = "bnm,bmd->bnd"}> : () -> ()
    %cst_79 = arith.constant dense<0.000000e+00> : vector<1x8x8xf32>
    %201 = tpu.matmul %200, %188, %cst_79 {dimension_numbers = #tpu.dot_dimension_numbers<[2], [1], [1], [2], [0, 0, 0, 1, 1, 2], [0], [0]>} : vector<1x8x16xbf16>, vector<1x16x8xbf16>, vector<1x8x8xf32> -> vector<1x8x8xf32>
    "tpu.trace_stop"() : () -> ()
    %202 = vector.shape_cast %201 : vector<1x8x8xf32> to vector<8x8xf32>
    %c0_80 = arith.constant 0 : index
    %c0_81 = arith.constant 0 : index
    %203 = vector.load %arg25[%c0_80, %c0_81] : memref<8x32xf32, #tpu.memory_space<vmem>>, vector<8x8xf32>
    tpu.vector_store %arg25[%c0_80, %c0_81], %202 {strides = array<i32>} : memref<8x32xf32, #tpu.memory_space<vmem>>, vector<8x8xf32>,
    %204 = vector.extract_strided_slice %180 {offsets = [0, 8], sizes = [8, 8], strides = [1, 1]} : vector<8x32xbf16> to vector<8x8xbf16>
    %205 = vector.shape_cast %204 : vector<8x8xbf16> to vector<1x8x8xbf16>
    %206 = vector.extract_strided_slice %181 {offsets = [0, 8], sizes = [16, 8], strides = [1, 1]} : vector<16x32xbf16> to vector<16x8xbf16>
    %207 = vector.shape_cast %206 : vector<16x8xbf16> to vector<1x16x8xbf16>
    %208 = vector.extract_strided_slice %182 {offsets = [0, 8], sizes = [16, 8], strides = [1, 1]} : vector<16x32xbf16> to vector<16x8xbf16>
    %209 = vector.shape_cast %208 : vector<16x8xbf16> to vector<1x16x8xbf16>
    "tpu.trace_start"() <{level = 10 : i32, message = "bnd,bmd->bnm"}> : () -> ()
    %cst_82 = arith.constant dense<0.000000e+00> : vector<1x8x16xf32>
    %210 = tpu.matmul %205, %207, %cst_82 {dimension_numbers = #tpu.dot_dimension_numbers<[2], [2], [1], [1], [0, 0, 0, 1, 1, 1], [0], [0]>} : vector<1x8x8xbf16>, vector<1x16x8xbf16>, vector<1x8x16xf32> -> vector<1x8x16xf32>
    "tpu.trace_stop"() : () -> ()
    %cst_83 = arith.constant dense<0xFF800000> : vector<1x8xf32>
    %211 = vector.multi_reduction <maximumf>, %210, %cst_83 [2] : vector<1x8x16xf32> to vector<1x8xf32>
    %212 = vector.shape_cast %211 : vector<1x8xf32> to vector<1x8x1xf32>
    %213 = vector.broadcast %212 : vector<1x8x1xf32> to vector<1x8x16xf32>
    %214 = arith.subf %210, %213 : vector<1x8x16xf32>
    %215 = math.exp %214 : vector<1x8x16xf32>
    %cst_84 = arith.constant dense<0.000000e+00> : vector<1x8xf32>
    %216 = vector.multi_reduction <add>, %215, %cst_84 [2] : vector<1x8x16xf32> to vector<1x8xf32>
    %217 = vector.shape_cast %216 : vector<1x8xf32> to vector<1x8x1xf32>
    %218 = tpu.reciprocal %217 {approx = true} : vector<1x8x1xf32> -> vector<1x8x1xf32>
    %219 = vector.broadcast %218 : vector<1x8x1xf32> to vector<1x8x16xf32>
    %220 = arith.mulf %215, %219 : vector<1x8x16xf32>
    %221 = arith.truncf %220 : vector<1x8x16xf32> to vector<1x8x16xbf16>
    "tpu.trace_start"() <{level = 10 : i32, message = "bnm,bmd->bnd"}> : () -> ()
    %cst_85 = arith.constant dense<0.000000e+00> : vector<1x8x8xf32>
    %222 = tpu.matmul %221, %209, %cst_85 {dimension_numbers = #tpu.dot_dimension_numbers<[2], [1], [1], [2], [0, 0, 0, 1, 1, 2], [0], [0]>} : vector<1x8x16xbf16>, vector<1x16x8xbf16>, vector<1x8x8xf32> -> vector<1x8x8xf32>
    "tpu.trace_stop"() : () -> ()
    %223 = vector.shape_cast %222 : vector<1x8x8xf32> to vector<8x8xf32>
    %c0_86 = arith.constant 0 : index
    %c8_87 = arith.constant 8 : index
    %224 = vector.load %arg25[%c0_86, %c8_87] : memref<8x32xf32, #tpu.memory_space<vmem>>, vector<8x8xf32>
    tpu.vector_store %arg25[%c0_86, %c8_87], %223 {strides = array<i32>} : memref<8x32xf32, #tpu.memory_space<vmem>>, vector<8x8xf32>,
    %225 = vector.extract_strided_slice %180 {offsets = [0, 16], sizes = [8, 8], strides = [1, 1]} : vector<8x32xbf16> to vector<8x8xbf16>
    %226 = vector.shape_cast %225 : vector<8x8xbf16> to vector<1x8x8xbf16>
    %227 = vector.extract_strided_slice %181 {offsets = [0, 16], sizes = [16, 8], strides = [1, 1]} : vector<16x32xbf16> to vector<16x8xbf16>
    %228 = vector.shape_cast %227 : vector<16x8xbf16> to vector<1x16x8xbf16>
    %229 = vector.extract_strided_slice %182 {offsets = [0, 16], sizes = [16, 8], strides = [1, 1]} : vector<16x32xbf16> to vector<16x8xbf16>
    %230 = vector.shape_cast %229 : vector<16x8xbf16> to vector<1x16x8xbf16>
    "tpu.trace_start"() <{level = 10 : i32, message = "bnd,bmd->bnm"}> : () -> ()
    %cst_88 = arith.constant dense<0.000000e+00> : vector<1x8x16xf32>
    %231 = tpu.matmul %226, %228, %cst_88 {dimension_numbers = #tpu.dot_dimension_numbers<[2], [2], [1], [1], [0, 0, 0, 1, 1, 1], [0], [0]>} : vector<1x8x8xbf16>, vector<1x16x8xbf16>, vector<1x8x16xf32> -> vector<1x8x16xf32>
    "tpu.trace_stop"() : () -> ()
    %cst_89 = arith.constant dense<0xFF800000> : vector<1x8xf32>
    %232 = vector.multi_reduction <maximumf>, %231, %cst_89 [2] : vector<1x8x16xf32> to vector<1x8xf32>
    %233 = vector.shape_cast %232 : vector<1x8xf32> to vector<1x8x1xf32>
    %234 = vector.broadcast %233 : vector<1x8x1xf32> to vector<1x8x16xf32>
    %235 = arith.subf %231, %234 : vector<1x8x16xf32>
    %236 = math.exp %235 : vector<1x8x16xf32>
    %cst_90 = arith.constant dense<0.000000e+00> : vector<1x8xf32>
    %237 = vector.multi_reduction <add>, %236, %cst_90 [2] : vector<1x8x16xf32> to vector<1x8xf32>
    %238 = vector.shape_cast %237 : vector<1x8xf32> to vector<1x8x1xf32>
    %239 = tpu.reciprocal %238 {approx = true} : vector<1x8x1xf32> -> vector<1x8x1xf32>
    %240 = vector.broadcast %239 : vector<1x8x1xf32> to vector<1x8x16xf32>
    %241 = arith.mulf %236, %240 : vector<1x8x16xf32>
    %242 = arith.truncf %241 : vector<1x8x16xf32> to vector<1x8x16xbf16>
    "tpu.trace_start"() <{level = 10 : i32, message = "bnm,bmd->bnd"}> : () -> ()
    %cst_91 = arith.constant dense<0.000000e+00> : vector<1x8x8xf32>
    %243 = tpu.matmul %242, %230, %cst_91 {dimension_numbers = #tpu.dot_dimension_numbers<[2], [1], [1], [2], [0, 0, 0, 1, 1, 2], [0], [0]>} : vector<1x8x16xbf16>, vector<1x16x8xbf16>, vector<1x8x8xf32> -> vector<1x8x8xf32>
    "tpu.trace_stop"() : () -> ()
    %244 = vector.shape_cast %243 : vector<1x8x8xf32> to vector<8x8xf32>
    %c0_92 = arith.constant 0 : index
    %c16_93 = arith.constant 16 : index
    %245 = vector.load %arg25[%c0_92, %c16_93] : memref<8x32xf32, #tpu.memory_space<vmem>>, vector<8x8xf32>
    tpu.vector_store %arg25[%c0_92, %c16_93], %244 {strides = array<i32>} : memref<8x32xf32, #tpu.memory_space<vmem>>, vector<8x8xf32>,
    %246 = vector.extract_strided_slice %180 {offsets = [0, 24], sizes = [8, 8], strides = [1, 1]} : vector<8x32xbf16> to vector<8x8xbf16>
    %247 = vector.shape_cast %246 : vector<8x8xbf16> to vector<1x8x8xbf16>
    %248 = vector.extract_strided_slice %181 {offsets = [0, 24], sizes = [16, 8], strides = [1, 1]} : vector<16x32xbf16> to vector<16x8xbf16>
    %249 = vector.shape_cast %248 : vector<16x8xbf16> to vector<1x16x8xbf16>
    %250 = vector.extract_strided_slice %182 {offsets = [0, 24], sizes = [16, 8], strides = [1, 1]} : vector<16x32xbf16> to vector<16x8xbf16>
    %251 = vector.shape_cast %250 : vector<16x8xbf16> to vector<1x16x8xbf16>
    "tpu.trace_start"() <{level = 10 : i32, message = "bnd,bmd->bnm"}> : () -> ()
    %cst_94 = arith.constant dense<0.000000e+00> : vector<1x8x16xf32>
    %252 = tpu.matmul %247, %249, %cst_94 {dimension_numbers = #tpu.dot_dimension_numbers<[2], [2], [1], [1], [0, 0, 0, 1, 1, 1], [0], [0]>} : vector<1x8x8xbf16>, vector<1x16x8xbf16>, vector<1x8x16xf32> -> vector<1x8x16xf32>
    "tpu.trace_stop"() : () -> ()
    %cst_95 = arith.constant dense<0xFF800000> : vector<1x8xf32>
    %253 = vector.multi_reduction <maximumf>, %252, %cst_95 [2] : vector<1x8x16xf32> to vector<1x8xf32>
    %254 = vector.shape_cast %253 : vector<1x8xf32> to vector<1x8x1xf32>
    %255 = vector.broadcast %254 : vector<1x8x1xf32> to vector<1x8x16xf32>
    %256 = arith.subf %252, %255 : vector<1x8x16xf32>
    %257 = math.exp %256 : vector<1x8x16xf32>
    %cst_96 = arith.constant dense<0.000000e+00> : vector<1x8xf32>
    %258 = vector.multi_reduction <add>, %257, %cst_96 [2] : vector<1x8x16xf32> to vector<1x8xf32>
    %259 = vector.shape_cast %258 : vector<1x8xf32> to vector<1x8x1xf32>
    %260 = tpu.reciprocal %259 {approx = true} : vector<1x8x1xf32> -> vector<1x8x1xf32>
    %261 = vector.broadcast %260 : vector<1x8x1xf32> to vector<1x8x16xf32>
    %262 = arith.mulf %257, %261 : vector<1x8x16xf32>
    %263 = arith.truncf %262 : vector<1x8x16xf32> to vector<1x8x16xbf16>
    "tpu.trace_start"() <{level = 10 : i32, message = "bnm,bmd->bnd"}> : () -> ()
    %cst_97 = arith.constant dense<0.000000e+00> : vector<1x8x8xf32>
    %264 = tpu.matmul %263, %251, %cst_97 {dimension_numbers = #tpu.dot_dimension_numbers<[2], [1], [1], [2], [0, 0, 0, 1, 1, 2], [0], [0]>} : vector<1x8x16xbf16>, vector<1x16x8xbf16>, vector<1x8x8xf32> -> vector<1x8x8xf32>
    "tpu.trace_stop"() : () -> ()
    %265 = vector.shape_cast %264 : vector<1x8x8xf32> to vector<8x8xf32>
    %c0_98 = arith.constant 0 : index
    %c24_99 = arith.constant 24 : index
    %266 = vector.load %arg25[%c0_98, %c24_99] : memref<8x32xf32, #tpu.memory_space<vmem>>, vector<8x8xf32>
    tpu.vector_store %arg25[%c0_98, %c24_99], %265 {strides = array<i32>} : memref<8x32xf32, #tpu.memory_space<vmem>>, vector<8x8xf32>,
    %c0_100 = arith.constant 0 : index
    %c0_101 = arith.constant 0 : index
    %267 = vector.load %arg25[%c0_100, %c0_101] : memref<8x32xf32, #tpu.memory_space<vmem>>, vector<8x32xf32>
    %268 = arith.truncf %267 : vector<8x32xf32> to vector<8x32xbf16>
    %cst_102 = arith.constant dense<0.000000e+00> : vector<8x32xf32>
    %269 = tpu.matmul %268, %177, %cst_102 {dimension_numbers = #tpu.dot_dimension_numbers<[1], [0], [0], [1], [0, 0, 1, 1], [], []>} : vector<8x32xbf16>, vector<32x32xbf16>, vector<8x32xf32> -> vector<8x32xf32>
    %270 = vector.broadcast %179 : vector<1x32xf32> to vector<8x32xf32>
    %271 = arith.addf %269, %270 : vector<8x32xf32>
    %272 = arith.addf %135, %271 : vector<8x32xf32>
    %c0_103 = arith.constant 0 : index
    %c0_104 = arith.constant 0 : index
    %c0_105 = arith.constant 0 : index
    %273 = vector.load %arg15[%c0_103, %c0_104, %c0_105] : memref<1x1x32xf32, #tpu.memory_space<vmem>>, vector<1x1x32xf32>
    %274 = vector.shape_cast %273 : vector<1x1x32xf32> to vector<1x32xf32>
    %c0_106 = arith.constant 0 : index
    %c0_107 = arith.constant 0 : index
    %c0_108 = arith.constant 0 : index
    %275 = vector.load %arg16[%c0_106, %c0_107, %c0_108] : memref<1x1x32xf32, #tpu.memory_space<vmem>>, vector<1x1x32xf32>
    %276 = vector.shape_cast %275 : vector<1x1x32xf32> to vector<1x32xf32>
    %cst_109 = arith.constant dense<0.000000e+00> : vector<8xf32>
    %277 = vector.multi_reduction <add>, %272, %cst_109 [1] : vector<8x32xf32> to vector<8xf32>
    %278 = vector.shape_cast %277 : vector<8xf32> to vector<8x1xf32>
    %cst_110 = arith.constant 3.200000e+01 : f32
    %279 = vector.broadcast %cst_110 : f32 to vector<8x1xf32>
    %280 = arith.divf %278, %279 : vector<8x1xf32>
    %281 = vector.broadcast %280 : vector<8x1xf32> to vector<8x32xf32>
    %282 = arith.subf %272, %281 : vector<8x32xf32>
    %283 = arith.mulf %282, %282 : vector<8x32xf32>
    %cst_111 = arith.constant dense<0.000000e+00> : vector<8xf32>
    %284 = vector.multi_reduction <add>, %283, %cst_111 [1] : vector<8x32xf32> to vector<8xf32>
    %285 = vector.shape_cast %284 : vector<8xf32> to vector<8x1xf32>
    %cst_112 = arith.constant 3.200000e+01 : f32
    %286 = vector.broadcast %cst_112 : f32 to vector<8x1xf32>
    %287 = arith.divf %285, %286 : vector<8x1xf32>
    %288 = vector.broadcast %280 : vector<8x1xf32> to vector<8x32xf32>
    %289 = arith.subf %272, %288 : vector<8x32xf32>
    %cst_113 = arith.constant 9.99999974E-6 : f32
    %290 = vector.broadcast %cst_113 : f32 to vector<8x1xf32>
    %291 = arith.addf %287, %290 : vector<8x1xf32>
    %292 = math.rsqrt %291 : vector<8x1xf32>
    %293 = vector.broadcast %292 : vector<8x1xf32> to vector<8x32xf32>
    %294 = arith.mulf %289, %293 : vector<8x32xf32>
    %295 = vector.broadcast %274 : vector<1x32xf32> to vector<8x32xf32>
    %296 = arith.mulf %294, %295 : vector<8x32xf32>
    %297 = vector.broadcast %276 : vector<1x32xf32> to vector<8x32xf32>
    %298 = arith.addf %296, %297 : vector<8x32xf32>
    %c0_114 = arith.constant 0 : index
    %c0_115 = arith.constant 0 : index
    %c0_116 = arith.constant 0 : index
    %299 = vector.load %arg17[%c0_114, %c0_115, %c0_116] : memref<1x32x64xbf16, #tpu.memory_space<vmem>>, vector<1x32x64xbf16>
    %300 = vector.shape_cast %299 : vector<1x32x64xbf16> to vector<32x64xbf16>
    %301 = arith.truncf %298 : vector<8x32xf32> to vector<8x32xbf16>
    %cst_117 = arith.constant dense<0.000000e+00> : vector<8x64xf32>
    %302 = tpu.matmul %301, %300, %cst_117 {dimension_numbers = #tpu.dot_dimension_numbers<[1], [0], [0], [1], [0, 0, 1, 1], [], []>} : vector<8x32xbf16>, vector<32x64xbf16>, vector<8x64xf32> -> vector<8x64xf32>
    %c0_118 = arith.constant 0 : index
    %c0_119 = arith.constant 0 : index
    %c0_120 = arith.constant 0 : index
    %303 = vector.load %arg18[%c0_118, %c0_119, %c0_120] : memref<1x1x64xf32, #tpu.memory_space<vmem>>, vector<1x1x64xf32>
    %304 = vector.shape_cast %303 : vector<1x1x64xf32> to vector<1x64xf32>
    %305 = vector.broadcast %304 : vector<1x64xf32> to vector<8x64xf32>
    %306 = arith.addf %302, %305 : vector<8x64xf32>
    %cst_121 = arith.constant 5.000000e-01 : f32
    %307 = vector.broadcast %cst_121 : f32 to vector<8x64xf32>
    %308 = arith.mulf %307, %306 : vector<8x64xf32>
    %cst_122 = arith.constant 4.471500e-02 : f32
    %309 = vector.broadcast %cst_122 : f32 to vector<8x64xf32>
    %310 = arith.mulf %309, %306 : vector<8x64xf32>
    %311 = arith.mulf %310, %306 : vector<8x64xf32>
    %312 = arith.mulf %311, %306 : vector<8x64xf32>
    %313 = arith.addf %306, %312 : vector<8x64xf32>
    %cst_123 = arith.constant 0.797884583 : f32
    %314 = vector.broadcast %cst_123 : f32 to vector<8x64xf32>
    %315 = arith.mulf %314, %313 : vector<8x64xf32>
    %316 = math.tanh %315 : vector<8x64xf32>
    %cst_124 = arith.constant 1.000000e+00 : f32
    %317 = vector.broadcast %cst_124 : f32 to vector<8x64xf32>
    %318 = arith.addf %317, %316 : vector<8x64xf32>
    %319 = arith.mulf %308, %318 : vector<8x64xf32>
    %c0_125 = arith.constant 0 : index
    %c0_126 = arith.constant 0 : index
    %c0_127 = arith.constant 0 : index
    %320 = vector.load %arg19[%c0_125, %c0_126, %c0_127] : memref<1x64x32xbf16, #tpu.memory_space<vmem>>, vector<1x64x32xbf16>
    %321 = vector.shape_cast %320 : vector<1x64x32xbf16> to vector<64x32xbf16>
    %322 = arith.truncf %319 : vector<8x64xf32> to vector<8x64xbf16>
    %cst_128 = arith.constant dense<0.000000e+00> : vector<8x32xf32>
    %323 = tpu.matmul %322, %321, %cst_128 {dimension_numbers = #tpu.dot_dimension_numbers<[1], [0], [0], [1], [0, 0, 1, 1], [], []>} : vector<8x64xbf16>, vector<64x32xbf16>, vector<8x32xf32> -> vector<8x32xf32>
    %324 = arith.addf %272, %323 : vector<8x32xf32>
    %c0_129 = arith.constant 0 : index
    %c0_130 = arith.constant 0 : index
    %c0_131 = arith.constant 0 : index
    %325 = vector.load %arg20[%c0_129, %c0_130, %c0_131] : memref<1x1x32xf32, #tpu.memory_space<vmem>>, vector<1x1x32xf32>
    %326 = vector.shape_cast %325 : vector<1x1x32xf32> to vector<1x32xf32>
    %327 = vector.broadcast %326 : vector<1x32xf32> to vector<8x32xf32>
    %328 = arith.addf %324, %327 : vector<8x32xf32>
    %c0_132 = arith.constant 0 : index
    %c0_133 = arith.constant 0 : index
    %329 = vector.load %arg24[%c0_132, %c0_133] : memref<8x32xf32, #tpu.memory_space<vmem>>, vector<8x32xf32>
    tpu.vector_store %arg24[%c0_132, %c0_133], %328 {strides = array<i32>} : memref<8x32xf32, #tpu.memory_space<vmem>>, vector<8x32xf32>,
    %c1_i32 = arith.constant 1 : i32
    %330 = arith.cmpi eq, %arg1, %c1_i32 : i32
    %331 = arith.extui %330 : i1 to i32
    %c0_i32_134 = arith.constant 0 : i32
    %332 = arith.cmpi ne, %331, %c0_i32_134 : i32
    scf.if %332 {
      %c0_135 = arith.constant 0 : index
      %c0_136 = arith.constant 0 : index
      %333 = vector.load %arg21[%c0_135, %c0_136] : memref<1x32xf32, #tpu.memory_space<vmem>>, vector<1x32xf32>
      %c0_137 = arith.constant 0 : index
      %c0_138 = arith.constant 0 : index
      %334 = vector.load %arg22[%c0_137, %c0_138] : memref<1x32xf32, #tpu.memory_space<vmem>>, vector<1x32xf32>
      %cst_139 = arith.constant dense<0.000000e+00> : vector<8xf32>
      %335 = vector.multi_reduction <add>, %328, %cst_139 [1] : vector<8x32xf32> to vector<8xf32>
      %336 = vector.shape_cast %335 : vector<8xf32> to vector<8x1xf32>
      %cst_140 = arith.constant 3.200000e+01 : f32
      %337 = vector.broadcast %cst_140 : f32 to vector<8x1xf32>
      %338 = arith.divf %336, %337 : vector<8x1xf32>
      %339 = vector.broadcast %338 : vector<8x1xf32> to vector<8x32xf32>
      %340 = arith.subf %328, %339 : vector<8x32xf32>
      %341 = arith.mulf %340, %340 : vector<8x32xf32>
      %cst_141 = arith.constant dense<0.000000e+00> : vector<8xf32>
      %342 = vector.multi_reduction <add>, %341, %cst_141 [1] : vector<8x32xf32> to vector<8xf32>
      %343 = vector.shape_cast %342 : vector<8xf32> to vector<8x1xf32>
      %cst_142 = arith.constant 3.200000e+01 : f32
      %344 = vector.broadcast %cst_142 : f32 to vector<8x1xf32>
      %345 = arith.divf %343, %344 : vector<8x1xf32>
      %346 = vector.broadcast %338 : vector<8x1xf32> to vector<8x32xf32>
      %347 = arith.subf %328, %346 : vector<8x32xf32>
      %cst_143 = arith.constant 9.99999974E-6 : f32
      %348 = vector.broadcast %cst_143 : f32 to vector<8x1xf32>
      %349 = arith.addf %345, %348 : vector<8x1xf32>
      %350 = math.rsqrt %349 : vector<8x1xf32>
      %351 = vector.broadcast %350 : vector<8x1xf32> to vector<8x32xf32>
      %352 = arith.mulf %347, %351 : vector<8x32xf32>
      %353 = vector.broadcast %333 : vector<1x32xf32> to vector<8x32xf32>
      %354 = arith.mulf %352, %353 : vector<8x32xf32>
      %355 = vector.broadcast %334 : vector<1x32xf32> to vector<8x32xf32>
      %356 = arith.addf %354, %355 : vector<8x32xf32>
      %357 = vector.shape_cast %356 : vector<8x32xf32> to vector<1x8x32xf32>
      %c0_144 = arith.constant 0 : index
      %c0_145 = arith.constant 0 : index
      %c0_146 = arith.constant 0 : index
      %358 = vector.load %arg23[%c0_144, %c0_145, %c0_146] : memref<1x8x32xf32, #tpu.memory_space<vmem>>, vector<1x8x32xf32>
      tpu.vector_store %arg23[%c0_144, %c0_145, %c0_146], %357 {strides = array<i32>} : memref<1x8x32xf32, #tpu.memory_space<vmem>>, vector<1x8x32xf32>,
    } else {
    }
    return
  }
  func.func @transform_0(%arg0: i32, %arg1: i32) -> (i32, i32, i32) {
    %c0_i32 = arith.constant 0 : i32
    %c0_i32_0 = arith.constant 0 : i32
    %c0_i32_1 = arith.constant 0 : i32
    return %arg0, %c0_i32, %c0_i32_0 : i32, i32, i32
  }
  func.func @transform_1(%arg0: i32, %arg1: i32) -> (i32, i32, i32) {
    %c0_i32 = arith.constant 0 : i32
    %c0_i32_0 = arith.constant 0 : i32
    %c0_i32_1 = arith.constant 0 : i32
    return %arg0, %c0_i32, %c0_i32_0 : i32, i32, i32
  }
  func.func @transform_2(%arg0: i32, %arg1: i32) -> (i32, i32, i32) {
    %c0_i32 = arith.constant 0 : i32
    %c0_i32_0 = arith.constant 0 : i32
    %c0_i32_1 = arith.constant 0 : i32
    return %arg1, %c0_i32, %c0_i32_0 : i32, i32, i32
  }
  func.func @transform_3(%arg0: i32, %arg1: i32) -> (i32, i32, i32) {
    %c0_i32 = arith.constant 0 : i32
    %c0_i32_0 = arith.constant 0 : i32
    %c0_i32_1 = arith.constant 0 : i32
    return %arg1, %c0_i32, %c0_i32_0 : i32, i32, i32
  }
  func.func @transform_4(%arg0: i32, %arg1: i32) -> (i32, i32, i32) {
    %c0_i32 = arith.constant 0 : i32
    %c0_i32_0 = arith.constant 0 : i32
    %c0_i32_1 = arith.constant 0 : i32
    return %arg1, %c0_i32, %c0_i32_0 : i32, i32, i32
  }
  func.func @transform_5(%arg0: i32, %arg1: i32) -> (i32, i32, i32) {
    %c0_i32 = arith.constant 0 : i32
    %c0_i32_0 = arith.constant 0 : i32
    %c0_i32_1 = arith.constant 0 : i32
    return %arg1, %c0_i32, %c0_i32_0 : i32, i32, i32
  }
  func.func @transform_6(%arg0: i32, %arg1: i32) -> (i32, i32, i32) {
    %c0_i32 = arith.constant 0 : i32
    %c0_i32_0 = arith.constant 0 : i32
    %c0_i32_1 = arith.constant 0 : i32
    return %arg1, %c0_i32, %c0_i32_0 : i32, i32, i32
  }
  func.func @transform_7(%arg0: i32, %arg1: i32) -> (i32, i32, i32) {
    %c0_i32 = arith.constant 0 : i32
    %c0_i32_0 = arith.constant 0 : i32
    %c0_i32_1 = arith.constant 0 : i32
    return %arg1, %c0_i32, %c0_i32_0 : i32, i32, i32
  }
  func.func @transform_8(%arg0: i32, %arg1: i32) -> (i32, i32, i32) {
    %c0_i32 = arith.constant 0 : i32
    %c0_i32_0 = arith.constant 0 : i32
    %c0_i32_1 = arith.constant 0 : i32
    return %arg1, %c0_i32, %c0_i32_0 : i32, i32, i32
  }
  func.func @transform_9(%arg0: i32, %arg1: i32) -> (i32, i32, i32) {
    %c0_i32 = arith.constant 0 : i32
    %c0_i32_0 = arith.constant 0 : i32
    %c0_i32_1 = arith.constant 0 : i32
    return %arg1, %c0_i32, %c0_i32_0 : i32, i32, i32
  }
  func.func @transform_10(%arg0: i32, %arg1: i32) -> (i32, i32, i32) {
    %c0_i32 = arith.constant 0 : i32
    %c0_i32_0 = arith.constant 0 : i32
    %c0_i32_1 = arith.constant 0 : i32
    return %arg1, %c0_i32, %c0_i32_0 : i32, i32, i32
  }
  func.func @transform_11(%arg0: i32, %arg1: i32) -> (i32, i32, i32) {
    %c0_i32 = arith.constant 0 : i32
    %c0_i32_0 = arith.constant 0 : i32
    %c0_i32_1 = arith.constant 0 : i32
    return %arg1, %c0_i32, %c0_i32_0 : i32, i32, i32
  }
  func.func @transform_12(%arg0: i32, %arg1: i32) -> (i32, i32, i32) {
    %c0_i32 = arith.constant 0 : i32
    %c0_i32_0 = arith.constant 0 : i32
    %c0_i32_1 = arith.constant 0 : i32
    return %arg1, %c0_i32, %c0_i32_0 : i32, i32, i32
  }
  func.func @transform_13(%arg0: i32, %arg1: i32) -> (i32, i32, i32) {
    %c0_i32 = arith.constant 0 : i32
    %c0_i32_0 = arith.constant 0 : i32
    %c0_i32_1 = arith.constant 0 : i32
    return %arg1, %c0_i32, %c0_i32_0 : i32, i32, i32
  }
  func.func @transform_14(%arg0: i32, %arg1: i32) -> (i32, i32, i32) {
    %c0_i32 = arith.constant 0 : i32
    %c0_i32_0 = arith.constant 0 : i32
    %c0_i32_1 = arith.constant 0 : i32
    return %arg1, %c0_i32, %c0_i32_0 : i32, i32, i32
  }
  func.func @transform_15(%arg0: i32, %arg1: i32) -> (i32, i32, i32) {
    %c0_i32 = arith.constant 0 : i32
    %c0_i32_0 = arith.constant 0 : i32
    %c0_i32_1 = arith.constant 0 : i32
    return %arg1, %c0_i32, %c0_i32_0 : i32, i32, i32
  }
  func.func @transform_16(%arg0: i32, %arg1: i32) -> (i32, i32, i32) {
    %c0_i32 = arith.constant 0 : i32
    %c0_i32_0 = arith.constant 0 : i32
    %c0_i32_1 = arith.constant 0 : i32
    return %arg1, %c0_i32, %c0_i32_0 : i32, i32, i32
  }
  func.func @transform_17(%arg0: i32, %arg1: i32) -> (i32, i32, i32) {
    %c0_i32 = arith.constant 0 : i32
    %c0_i32_0 = arith.constant 0 : i32
    %c0_i32_1 = arith.constant 0 : i32
    return %arg1, %c0_i32, %c0_i32_0 : i32, i32, i32
  }
  func.func @transform_18(%arg0: i32, %arg1: i32) -> (i32, i32, i32) {
    %c0_i32 = arith.constant 0 : i32
    %c0_i32_0 = arith.constant 0 : i32
    %c0_i32_1 = arith.constant 0 : i32
    return %arg1, %c0_i32, %c0_i32_0 : i32, i32, i32
  }
  func.func @transform_19(%arg0: i32, %arg1: i32) -> (i32, i32) {
    %c0_i32 = arith.constant 0 : i32
    %c0_i32_0 = arith.constant 0 : i32
    %c0_i32_1 = arith.constant 0 : i32
    return %c0_i32, %c0_i32_0 : i32, i32
  }
  func.func @transform_20(%arg0: i32, %arg1: i32) -> (i32, i32) {
    %c0_i32 = arith.constant 0 : i32
    %c0_i32_0 = arith.constant 0 : i32
    %c0_i32_1 = arith.constant 0 : i32
    return %c0_i32, %c0_i32_0 : i32, i32
  }
  func.func @transform_21(%arg0: i32, %arg1: i32) -> (i32, i32, i32) {
    %c0_i32 = arith.constant 0 : i32
    %c0_i32_0 = arith.constant 0 : i32
    %c0_i32_1 = arith.constant 0 : i32
    return %arg0, %c0_i32, %c0_i32_0 : i32, i32, i32
  }
}

</mosaic_0001>

<bundles_post_ra>
// kernel: tpu_custom_call.1
= control target key start
LH: loop header
LB: loop body
LE: loop exit
PB: predicated region body
PF: predicated region fallthrough
CT: control target
= control target key end

     0   :  { %s4495_s0 = inlined_call_operand.hbm [shape: f32[2,8,32], index: 0, kind: input, shape index: {}]   ;;  %s4496_s1 = inlined_call_operand.vmem [shape: f32[2,16,32], index: 1, kind: input, shape index: {}]   ;;  %s4497_s2 = inlined_call_operand.vmem [shape: f32[2,1,32], index: 2, kind: input, shape index: {}]   ;;  %s4498_s3 = inlined_call_operand.vmem [shape: f32[2,1,32], index: 3, kind: input, shape index: {}]   ;;  %s4499_s4 = inlined_call_operand.vmem [shape: bf16[2,32,96], index: 4, kind: input, shape index: {}]   ;;  %s4500_s5 = inlined_call_operand.vmem [shape: bf16[2,32,32], index: 5, kind: input, shape index: {}]   ;;  %s4501_s6 = inlined_call_operand.vmem [shape: f32[2,1,32], index: 6, kind: input, shape index: {}]   ;;  %s4502_s7 = inlined_call_operand.vmem [shape: f32[2,1,32], index: 7, kind: input, shape index: {}]   ;;  %s4503_s8 = inlined_call_operand.vmem [shape: f32[2,1,32], index: 8, kind: input, shape index: {}]   ;;  %s4504_s9 = inlined_call_operand.hbm [shape: bf16[2,32,32], index: 9, kind: input, shape index: {}]   ;;  %s4505_s10 = inlined_call_operand.hbm [shape: bf16[2,32,64], index: 10, kind: input, shape index: {}]   ;;  %s4506_s11 = inlined_call_operand.hbm [shape: bf16[2,32,32], index: 11, kind: input, shape index: {}]   ;;  %s4507_s12 = inlined_call_operand.vmem [shape: f32[2,1,32], index: 12, kind: input, shape index: {}]   ;;  %s4508_s13 = inlined_call_operand.vmem [shape: f32[2,1,32], index: 13, kind: input, shape index: {}]   ;;  %s4509_s14 = inlined_call_operand.vmem [shape: f32[2,1,32], index: 14, kind: input, shape index: {}]   ;;  %s4510_s15 = inlined_call_operand.hbm [shape: bf16[2,32,64], index: 15, kind: input, shape index: {}]   ;;  %s4511_s16 = inlined_call_operand.vmem [shape: f32[2,1,64], index: 16, kind: input, shape index: {}]   ;;  %s4512_s17 = inlined_call_operand.vmem [shape: bf16[2,64,32], index: 17, kind: input, shape index: {}]   ;;  %s4513_s18 = inlined_call_operand.vmem [shape: f32[2,1,32], index: 18, kind: input, shape index: {}]   ;;  %s4514_s19 = inlined_call_operand.vmem [shape: f32[1,32], index: 19, kind: input, shape index: {}]   ;;  %s4515_s20 = inlined_call_operand.vmem [shape: f32[1,32], index: 20, kind: input, shape index: {}]   ;;  %s4516_s21 = inlined_call_operand.hbm [shape: f32[2,8,32], index: 21, kind: output, shape index: {}]  }
   0x1   :  { %4542 = sst [smem:[#allocation34_spill]] %s4495_s0 }
   0x2   :  { %4543 = sst [smem:[#allocation35_spill]] %s4496_s1 }
   0x3   :  { %4544 = sst [smem:[#allocation36_spill]] %s4497_s2 }
   0x4   :  { %4545 = sst [smem:[#allocation37_spill]] %s4498_s3 }
   0x5   :  { %4546 = sst [smem:[#allocation38_spill]] %s4499_s4 }
   0x6   :  { %4547 = sst [smem:[#allocation39_spill]] %s4500_s5 }
   0x7   :  { %4548 = sst [smem:[#allocation40_spill]] %s4501_s6 }
   0x8   :  { %4549 = sst [smem:[#allocation41_spill]] %s4502_s7 }
   0x9   :  { %4550 = sst [smem:[#allocation42_spill]] %s4503_s8 }
   0xa   :  { %4551 = sst [smem:[#allocation43_spill]] %s4504_s9 }
   0xb   :  { %4552 = sst [smem:[#allocation44_spill]] %s4505_s10 }
   0xc   :  { %4553 = sst [smem:[#allocation45_spill]] %s4506_s11 }
   0xd   :  { %4554 = sst [smem:[#allocation46_spill]] %s4507_s12 }
   0xe   :  { %4555 = sst [smem:[#allocation47_spill]] %s4508_s13 }
   0xf   :  { %4556 = sst [smem:[#allocation48_spill]] %s4509_s14 }
  0x10   :  { %4557 = sst [smem:[#allocation49_spill]] %s4510_s15 }
  0x11   :  { %4558 = sst [smem:[#allocation50_spill]] %s4511_s16 }
  0x12   :  { %4559 = sst [smem:[#allocation51_spill]] %s4512_s17 }
  0x13   :  { %4560 = sst [smem:[#allocation52_spill]] %s4513_s18 }
  0x14   :  { %4561 = sst [smem:[#allocation53_spill]] %s4514_s19 }
  0x15   :  { %4562 = sst [smem:[#allocation54_spill]] %s4515_s20 }
  0x16   :  { %4563 = sst [smem:[#allocation55_spill]] %s4516_s21 }
  0x17   :  { %26 = vsyncpa [#allocation5], 0 }
  0x18   :  { %28 = vsyncpa [#allocation5 + $0x1], 0 }
  0x19   :  { %29 = vsyncpa [#allocation8], 0 }
  0x1a   :  { %31 = vsyncpa [#allocation8 + $0x1], 0 }
  0x1b   :  { %32 = vsyncpa [#allocation11], 0 }
  0x1c   :  { %34 = vsyncpa [#allocation11 + $0x1], 0 }
  0x1d   :  { %35 = vsyncpa [#allocation6], 0 }
  0x1e   :  { %37 = vsyncpa [#allocation6 + $0x1], 0  ;;  %s3818_s2 = smov 0   ;;  %s3820_s25 = smov 0  }
  0x1f   :  { %s3822_s26 = smov 0   ;;  %s3824_s27 = smov 0  }
  0x20   :  { %s3826_s3 = smov 0   ;;  %s3828_s28 = smov 0  }
  0x21   :  { %s3830_s29 = smov 0   ;;  %s3832_s0 = smov 0  }
  0x22   :  { %s3834_s4 = smov 0   ;;  %s3836_s30 = smov 0  }
  0x23   :  { %s3838_s5 = smov 0  }
  0x24 LB: > { %4564 = sst [smem:[#allocation18_spill]] %s3646_s25  ;;  %p70_p0 = scmp.eq.s32.totalorder %s3682_s5, 0  ;;  %s3682_s5 = sphi %s3838_s5, %s43_s5   ;;  %s3678_s30 = sphi %s3836_s30, %s4660_s30   ;;  %s3674_s4 = sphi %s3834_s4, %s4659_s4   ;;  %s3670_s0 = sphi %s3832_s0, %s4658_s0   ;;  %s3666_s29 = sphi %s3830_s29, %s4657_s29   ;;  %s3662_s28 = sphi %s3828_s28, %s4656_s28   ;;  %s3658_s3 = sphi %s3826_s3, %s4655_s3   ;;  %s3654_s27 = sphi %s3824_s27, %s4654_s27   ;;  %s3650_s26 = sphi %s3822_s26, %s4653_s26   ;;  %s3646_s25 = sphi %s3820_s25, %s4652_s25   ;;  %s3642_s2 = sphi %s3818_s2, %s4651_s2  }
  0x25   : > { %4565 = sst [smem:[#allocation19_spill]] %s3650_s26  ;;  %p303_p1 = scmp.ne.s32.totalorder %s3650_s26, %s3646_s25 }
  0x26   : > { %4566 = sst [smem:[#allocation20_spill]] %s3654_s27  ;;  %p4526_p2 = scmp.lt.s32.totalorder %s3682_s5, 4 }
  0x27   : > { %4567 = sst [smem:[#allocation21_spill]] %s3658_s3  ;;  %p305_p3 = por %p303_p1, %p70_p0 }
  0x28   : > { %4568 = sst [smem:[#allocation22_spill]] %s3662_s28  ;;  %s4518_s1 = sand.u32 1, %s3682_s5  }
  0x29   : > { %4569 = sst [smem:[#allocation23_spill]] %s3666_s29  ;;  %s715_s24 = sand.u32 1, %s3650_s26  }
  0x2a   : > { %4570 = sst [smem:[#allocation24_spill]] %s3670_s0  ;;  %s3883_s21 = sshll.u32 %s715_s24, 4 }
  0x2b   : > { %4571 = sst [smem:[#allocation25_spill]] %s3674_s4  ;;  %s3886_s20 = sshll.u32 %s3674_s4, 8 }
  0x2c   : > { %4572 = sst [smem:[#allocation26_spill]] %s3678_s30  ;;  %s717_s16 = scalar_lea.vmem [#allocation7], %s3883_s21 }
  0x2d   : > { %4573 = sst [smem:[#allocation27_spill]] %s3682_s5  ;;  %s724_s22 = sshll.u32 %s717_s16, 4  ;;  %s725_s22 = int_to_ptr.vmem [resolvable:$true] %s724_s22 }
  0x2e   : > { %s4574_s9 = sld [smem:[#allocation43_spill]]  ;;  %p3895_p4 = pnand %p4526_p2, %p305_p3 }
  0x2f   : > { %s3901_s24 = scalar_lea.sflag [#allocation8], %s4518_s1  ;;  %s3427_s14 = scalar_lea.vmem %s725_s22, 256 }
  0x30   : > { %p4523_p5 = pneg %p3895_p4  ;;  %p3428_p6 = scmp.ne.s32.totalorder %s725_s22, %s3427_s14 }
  0x31   : > { %s3684_s16 = smov [#allocation7]  }
  0x32   : > { %p3430_p7 = pnand %p3428_p6, %p4523_p5  ;;  %s3432_s18 = sshll.u32 %s3684_s16, 4  ;;  %s3433_s18 = int_to_ptr.vmem [resolvable:$false] %s3432_s18 }
  0x33   : > { %s3434_s19 = scalar_lea.vmem %s3433_s18, 512  ;;  %p3435_p9 = scmp.lt.s32.totalorder %s725_s22, %s3433_s18 }
  0x34   : > { %s723_s17 = scalar_lea.hbm %s4574_s9, %s3886_s20  ;;  %p3431_p8 = pneg %p3430_p7 }
  0x35   : > { %p3436_p10 = scmp.lt.s32.totalorder %s3434_s19, %s3427_s14 }
  0x37   : > { %p3437_p11 = por %p3436_p10, %p3435_p9 }
  0x39   : > { %p3438_p12 = pnand %p3437_p11, %p3431_p8 }
  0x3b   : > { %3441 = shalt.err (!%p3438_p12)
}
  0x3c   : > { %s4519_s9 = smov 64   ;;  %s4521_s1 = smov 4  }
  0x3d   : > { %3234 = dma.hbm_to_vmem [thread:$0]  (!%p3895_p4), %s723_s17, 256, %s725_s22, %s3901_s24, %s4519_s9, %s4519_s9, %s4521_s1  }
  0x3e   : > { %p2925_p13 = scmp.ge.s32.totalorder %s3682_s5, 1  ;;  %p833_p1 = scmp.lt.s32.totalorder %s3682_s5, 5 }
  0x3f   : > { %s4577_s11 = sld [smem:[#allocation45_spill]]  ;;  %s759_s13 = scalar_lea.vmem [#allocation10], %s3883_s21 }
  0x40   : > { %p3916_p3 = pnand %p2925_p13, %p833_p1  ;;  %s766_s12 = sshll.u32 %s759_s13, 4  ;;  %s767_s12 = int_to_ptr.vmem [resolvable:$true] %s766_s12 }
  0x41   : > { %s4578_s8 = sand.u32 1, %s3682_s5   ;;  %s3455_s6 = scalar_lea.vmem %s767_s12, 256 }
  0x42   : > { %s3927_s7 = scalar_lea.sflag [#allocation11], %s4578_s8  ;;  %p3456_p6 = scmp.ne.s32.totalorder %s767_s12, %s3455_s6 }
  0x43   : > { %s3687_s17 = smov [#allocation10]  }
  0x44   : > { %p3458_p7 = pnand %p3456_p6, %p4523_p5  ;;  %s3460_s22 = sshll.u32 %s3687_s17, 4  ;;  %s3461_s22 = int_to_ptr.vmem [resolvable:$false] %s3460_s22 }
  0x45   : > { %s765_s19 = scalar_lea.hbm %s4577_s11, %s3886_s20  ;;  %s3462_s9 = scalar_lea.vmem %s3461_s22, 512 }
  0x46   : > { %p3459_p8 = pneg %p3458_p7  ;;  %p3463_p9 = scmp.lt.s32.totalorder %s767_s12, %s3461_s22 }
  0x47   : > { %p3464_p10 = scmp.lt.s32.totalorder %s3462_s9, %s3455_s6 }
  0x49   : > { %p3465_p11 = por %p3464_p10, %p3463_p9 }
  0x4b   : > { %p3466_p12 = pnand %p3465_p11, %p3459_p8 }
  0x4d   : > { %3469 = shalt.err (!%p3466_p12)
}
  0x4e   : > { %s4579_s8 = smov 64   ;;  %s3939_s6 = sadd.s32 4294967295, %s3682_s5  }
  0x4f   : > { %3240 = dma.hbm_to_vmem [thread:$0]  (!%p3895_p4), %s765_s19, 256, %s767_s12, %s3927_s7, %s4579_s8, %s4579_s8, %s4521_s1  }
  0x50   : > { %s2908_s9 = sadd.s32 4294967294, %s3682_s5   ;;  %s4580_s13 = sadd.s32 1, %s3674_s4 }
  0x51   : > { %p53_p13 = scmp.ge.s32.totalorder %s4580_s13, 2  ;;  %s55_s16 = sadd.s32 1, %s3678_s30 }
  0x52   : > { %s62_s18 = sadd.s32 1, %s3662_s28  ;;  %p69_p1 = scmp.ne.s32.totalorder %s3662_s28, %s3658_s3 }
  0x53   : > { %s4581_s17 = smov %s4580_s13  ;;  %s4664_s16 = smov (!%p53_p13, %s55_s16), %s3678_s30 }
  0x54   : > { %s4662_s17 = smov (%p53_p13, %s4581_s17), 0  ;;  %p3958_p6 = por %p70_p0, %p69_p1 }
  0x55   : > { %4582 = sst [smem:[#allocation28_spill]] %s4662_s17  ;;  %p75_p7 = scmp.ne.s32.totalorder %s3658_s3, %s3654_s27 }
  0x56   : > { %p57_p8 = scmp.ge.s32.totalorder %s4664_s16, 2  ;;  %p76_p9 = scmp.eq.s32.totalorder %s3939_s6, 0 }
  0x57   : > { %s293_s19 = ssub.s32 %s3674_s4, %s4662_s17  ;;  %p309_p10 = scmp.ne.s32.totalorder %s3646_s25, %s3642_s2 }
  0x58   : > { %s4666_s16 = smov (%p57_p8, %s4664_s16), 0  ;;  %p3974_p11 = por %p76_p9, %p75_p7 }
  0x59   : > { %4584 = sst [smem:[#allocation29_spill]] %s4666_s16  ;;  %p294_p0 = scmp.eq.s32.totalorder %s293_s19, 0 }
  0x5a   : > { %s59_s13 = ssub.s32 %s3678_s30, %s4666_s16  ;;  %p3980_p12 = por %p309_p10, %p76_p9 }
  0x5b   : > { %p60_p13 = scmp.eq.s32.totalorder %s59_s13, 0  ;;  %p609_p5 = scmp.eq.s32.totalorder %s3939_s6, 3 }
  0x5c   : > { %s4586_s1 = scalar_select %p3980_p12, 1, 0 }
  0x5d   : > { %s4588_s11 = sadd.s32 1, %s3650_s26  ;;  %p3996_p8 = por %p609_p5, %p69_p1 }
  0x5e   : > { %4587 = sst [smem:[#allocation30_spill]] %s4586_s1  ;;  %p615_p2 = scmp.eq.s32.totalorder %s2908_s9, 3 }
  0x5f   : > { %s3988_s2 = scalar_select %p294_p0, %s3650_s26, %s4588_s11  }
  0x60   : > { %s3991_s17 = scalar_select %p60_p13, %s3662_s28, %s62_s18  }
  0x61   : > { %4589 = sst [smem:[#allocation31_spill]] %s3988_s2  ;;  %s641_s29 = sand.u32 1, %s3662_s28  }
  0x62   : > { %4590 = sst [smem:[#allocation32_spill]] %s3991_s17  ;;  %s2912_s19 = sshll.u32 %s3678_s30, 7 }
  0x63   : > { %p4005_p9 = por %p615_p2, %p75_p7  ;;  %s2911_s13 = sshll.u32 %s641_s29, 3 }
  0x64   : > { %s4594_s11 = sld [smem:[#allocation34_spill]]  ;;  %p4595_p10 = scmp.lt.s32.totalorder %s3682_s5, 4 }
  0x65   : > { %s4592_s16 = scalar_select %p4005_p9, 1, 0 }
  0x66   : > { %p4016_p0 = pnand %p4595_p10, %p3958_p6  ;;  %s645_s9 = scalar_lea.vmem [#allocation4], %s2911_s13 }
  0x67   : > { %4593 = sst [smem:[#allocation33_spill]] %s4592_s16  ;;  %s652_s17 = sshll.u32 %s645_s9, 4  ;;  %s653_s17 = int_to_ptr.vmem [resolvable:$true] %s652_s17 }
  0x68   : > { %s642_s30 = scalar_lea.sflag [#allocation5], %s641_s29  ;;  %p3472_p2 = pneg %p4016_p0 }
  0x69   : > { %s3483_s28 = scalar_lea.vmem %s653_s17, 128  ;;  %s3688_s26 = smov [#allocation4]  }
  0x6a   : > { %s650_s2 = scalar_lea.hbm %s4594_s11, %s2912_s19  ;;  %p3484_p5 = scmp.ne.s32.totalorder %s653_s17, %s3483_s28 }
  0x6b   : > { %s3488_s0 = sshll.u32 %s3688_s26, 4  ;;  %s3489_s0 = int_to_ptr.vmem [resolvable:$false] %s3488_s0 }
  0x6c   : > { %p3486_p1 = pnand %p3484_p5, %p3472_p2  ;;  %s3490_s1 = scalar_lea.vmem %s3489_s0, 256 }
  0x6d   : > { %p3491_p13 = scmp.lt.s32.totalorder %s653_s17, %s3489_s0  ;;  %p3492_p6 = scmp.lt.s32.totalorder %s3490_s1, %s3483_s28 }
  0x6e   : > { %p3487_p7 = pneg %p3486_p1 }
  0x6f   : > { %p3493_p10 = por %p3492_p6, %p3491_p13 }
  0x71   : > { %p3494_p9 = pnand %p3493_p10, %p3487_p7 }
  0x73   : > { %3497 = shalt.err (!%p3494_p9)
}
  0x74   : > { %3231 = dma.hbm_to_vmem [thread:$0]  (!%p4016_p0), %s650_s2, 128, %s653_s17, %s642_s30  }
  0x75   : > { %s4597_s10 = sld [smem:[#allocation44_spill]]  ;;  %s738_s13 = scalar_lea.vmem [#allocation9], %s3883_s21 }
  0x76   : > { %s745_s11 = sshll.u32 %s738_s13, 4  ;;  %p4598_p5 = pneg %p3895_p4  ;;  %s746_s11 = int_to_ptr.vmem [resolvable:$true] %s745_s11 }
  0x77   : > { %s3511_s26 = scalar_lea.vmem %s746_s11, 256  ;;  %s3689_s28 = smov [#allocation9]  }
  0x78   : > { %p3512_p2 = scmp.ne.s32.totalorder %s746_s11, %s3511_s26  ;;  %s3516_s9 = sshll.u32 %s3689_s28, 4  ;;  %s3517_s9 = int_to_ptr.vmem [resolvable:$false] %s3516_s9 }
  0x79   : > { %s3518_s18 = scalar_lea.vmem %s3517_s9, 512  ;;  %p3519_p9 = scmp.lt.s32.totalorder %s746_s11, %s3517_s9 }
  0x7a   : > { %p3514_p1 = pnand %p3512_p2, %p4598_p5  ;;  %p3520_p13 = scmp.lt.s32.totalorder %s3518_s18, %s3511_s26 }
  0x7b   : > { %s744_s19 = scalar_lea.hbm %s4597_s10, %s3886_s20 }
  0x7c   : > { %p3515_p7 = pneg %p3514_p1  ;;  %p3521_p0 = por %p3520_p13, %p3519_p9 }
  0x7e   : > { %p3522_p6 = pnand %p3521_p0, %p3515_p7 }
  0x80   : > { %3525 = shalt.err (!%p3522_p6)
}
  0x81   : > { %s4599_s30 = smov 4   ;;  %s4600_s15 = sld [smem:[#allocation49_spill]] }
  0x82   : > { %3237 = dma.hbm_to_vmem [thread:$0]  (!%p3895_p4), %s744_s19, 256, %s746_s11, %s3901_s24, %s4579_s8, %s4579_s8, %s4599_s30  }
  0x83   : > { %s798_s1 = scalar_lea.vmem [#allocation12], %s3883_s21  ;;  %p4601_p2 = pmov %p4598_p5 }
  0x84   : > { %s805_s29 = sshll.u32 %s798_s1, 4  ;;  %s3690_s13 = smov [#allocation12]   ;;  %s806_s29 = int_to_ptr.vmem [resolvable:$true] %s805_s29 }
  0x85   : > { %s3539_s12 = scalar_lea.vmem %s806_s29, 256  ;;  %s3544_s26 = sshll.u32 %s3690_s13, 4  ;;  %s3545_s26 = int_to_ptr.vmem [resolvable:$false] %s3544_s26 }
  0x86   : > { %p3540_p10 = scmp.ne.s32.totalorder %s806_s29, %s3539_s12  ;;  %s3546_s28 = scalar_lea.vmem %s3545_s26, 512 }
  0x87   : > { %s804_s0 = scalar_lea.hbm %s4600_s15, %s3886_s20  ;;  %p3547_p7 = scmp.lt.s32.totalorder %s806_s29, %s3545_s26 }
  0x88   : > { %p3542_p5 = pnand %p3540_p10, %p4601_p2  ;;  %p3548_p9 = scmp.lt.s32.totalorder %s3546_s28, %s3539_s12 }
  0x8a   : > { %p3543_p1 = pneg %p3542_p5  ;;  %p3549_p13 = por %p3548_p9, %p3547_p7 }
  0x8c   : > { %p3550_p0 = pnand %p3549_p13, %p3543_p1 }
  0x8e   : > { %3553 = shalt.err (!%p3550_p0)
}
  0x8f   : > { %3243 = dma.hbm_to_vmem [thread:$0]  (!%p3895_p4), %s804_s0, 256, %s806_s29, %s3927_s7, %s4579_s8, %s4579_s8, %s4599_s30  }
  0x90   : > { %837 = sbr.rel (%p3916_p3) target bundleno = 4664 (0x1238), region = 104  ;;  %s4055_s20 = sand.u32 (!%p3916_p3), 1, %s3658_s3  }
  0x91   : > { %s4535_s21 = sshll.u32 (!%p3916_p3), %s4055_s20, 3  ;;  %s840_s24 = scalar_lea.sflag (!%p3916_p3), [#allocation5], %s4055_s20 }
  0x92   : > { %s4061_s19 = scalar_lea.vmem (!%p3916_p3), [#allocation4], %s4535_s21 }
  0x95   : > { %3625 = dma.done.wait (%p3974_p11), %s840_s24, 128  }
  0x96   : > { %3627 = vsyncadd (%p3974_p11), %s840_s24, 4294967168  ;;  %s848_s23 = sand.u32 1, %s3939_s6   ;;  %s850_s14 = sand.u32 1, %s3646_s25  }
  0x97   : > { %s4069_s8 = sshll.u32 %s850_s14, 4  ;;  %s849_s11 = scalar_lea.sflag [#allocation8], %s848_s23 }
  0x98   : > { %3629 = dma.done.wait (%p3980_p12), %s849_s11, 512  }
  0x99   : > { %3631 = vsyncadd (%p3980_p12), %s849_s11, 4294966784  ;;  %s867_s18 = scalar_lea.sflag [#allocation11], %s848_s23 }
  0x9a   : > { %3633 = dma.done.wait (%p3980_p12), %s867_s18, 512  }
  0x9b   : > { %3635 = vsyncadd (%p3980_p12), %s867_s18, 4294966784  ;;  %s4603_s6 = sld [smem:[#allocation24_spill]]  ;;  %s879_s27 = scalar_lea.vmem [#allocation12], %s4069_s8 }
  0x9c   : > { %s4604_s17 = sld [smem:[#allocation23_spill]]  ;;  %s4619_s1 = sshll.u32 %s4055_s20, 3 }
  0x9d   : > { %s4605_s12 = sld [smem:[#allocation35_spill]] }
  0x9e   : > { %s4612_s3 = sld [smem:[#allocation42_spill]] }
  0x9f   : > { %s4615_s10 = sld [smem:[#allocation48_spill]] }
  0xa0   : > { %s4616_s15 = sld [smem:[#allocation50_spill]] }
  0xa1   : > { %p1008_p4 = scmp.lt.s32.totalorder %s4603_s6, 1 }
  0xa2   : > { %p1013_p3 = scmp.lt.s32.totalorder %s4604_s17, 1  ;;  %p2940_p11 = scmp.ne.s32.totalorder %s4604_s17, 0 }
  0xa3   : > { %s4668_s6 = smov (!%p1008_p4, %s4603_s6), 1 }
  0xa4   : > { %s4086_s2 = scalar_select %p1013_p3, %s4604_s17, 1 }
  0xa5   : > { %s3001_s0 = sshll.u32 %s4668_s6, 4  ;;  %s4608_s6 = sld [smem:[#allocation38_spill]] }
  0xa6   : > { %s4091_s13 = scalar_lea.vmem %s4605_s12, %s3001_s0  ;;  %s3002_s30 = sshll.u32 %s4086_s2, 4 }
  0xa7   : > { %s4609_s0 = sld [smem:[#allocation39_spill]]  ;;  %s1037_s25 = scalar_lea.vmem %s4612_s3, %s4086_s2 }
  0xa8   : > { %s1046_s26 = scalar_lea.vmem %s4615_s10, %s4086_s2  ;;  %s1049_s7 = scalar_lea.vmem %s4616_s15, %s4086_s2 }
  0xa9   : > { %s3004_s23 = sshll.u32 %s4086_s2, 5  ;;  %s4617_s3 = sld [smem:[#allocation51_spill]] }
  0xab   : > { %s4105_s21 = scalar_lea.vmem %s4608_s6, %s3002_s30  ;;  %s4618_s6 = sld [smem:[#allocation52_spill]] }
  0xad   : > { %s4110_s12 = scalar_lea.vmem %s4609_s0, %s3002_s30  ;;  %s4614_s30 = sld [smem:[#allocation47_spill]] }
  0xaf   : > { %s4144_s11 = scalar_lea.vmem %s4617_s3, %s3004_s23  ;;  %1062 = sbr.rel (%p2940_p11) target bundleno = 182 (0xb6), region = 128 }
  0xb1   : > { %s1057_s16 = scalar_lea.vmem %s4618_s6, %s4086_s2 }
  0xb3   : > { %s1043_s29 = scalar_lea.vmem %s4614_s30, %s4086_s2  ;;  %s4153_s30 = scalar_lea.vmem [#allocation13], %s4619_s1 }
  0xb4   : > { %v1063_v0 = vld [vmem:[%s4061_s19] sm:$0xff]  ;;  %vm1064_vm0 = vcmask 261120  }
  0xb5   : > { %1065 = vst.msk [vmem:[#allocation2] sm:$0xff] %vm1064_vm0, %v1063_v0 }
  0xb6 PF: > { %vm1069_vm1 = vcmask 261120   ;;  %v3356_v8 = vld [vmem:[%s4105_s21 + $0x8] sm:$0xff]   ;;  %v3691_v9 = vmov 0.0   ;;  %vm3692_vm2 = vmmov 0   ;;  %v3357_v10 = vld [vmem:[%s4105_s21] sm:$0xff]   ;;  %s4620_s17 = sld [smem:[#allocation36_spill]] }
  0xb7   : > { %3060 = vmatprep.subr.bf16.mxu1 %v3691_v9  ;;  %3064 = vmatprep.mubr.msk.bf16.mxu1 %vm3692_vm2, %v3691_v9  ;;  %s4622_s0 = sld [smem:[#allocation37_spill]]  ;;  %s3693_s28 = smov 96   ;;  %vm1169_vm3 = vcmask 64512   ;;  %vm1233_vm4 = vcmask 1043456   ;;  %vm1393_vm5 = vcmask 130112   ;;  %vm1509_vm6 = vcmask 195712  }
  0xb8   : > { %3061 = vmatpush3.bf16.msra.mxu1 %v3356_v8  ;;  %3074 = vmatprep.subr.bf16.mxu0 %v3691_v9  ;;  %s3694_s15 = smov 120   ;;  %s3695_s23 = smov 88   ;;  %vm1625_vm7 = vcmask 261312   ;;  %vm1897_vm8 = vcmask 130048   ;;  %vm2500_vm9 = vcmask 523264  }
  0xb9   : > { %3062 = vmatprep.subr.bf16.mxu1 %v3691_v9  ;;  %3076 = vmatprep.mubr.msk.bf16.mxu0 %vm3692_vm2, %v3691_v9  ;;  %s3696_s18 = smov 80   ;;  %s3697_s3 = smov 112  }
  0xba   : > { %s3698_s9 = smov 72   ;;  %s3699_s22 = smov 104  }
  0xbb   : > { %s3700_s6 = smov 64   ;;  %s3701_s1 = smov 56  }
  0xbc   : > { %v4157_v1 = vld [vmem:[#allocation2] sm:$0xff]  ;;  %3063 = vmatpush3.bf16.msra.mxu1 %v3357_v10  ;;  %s4621_s24 = scalar_lea.vmem %s4620_s17, %s4086_s2  ;;  %s3702_s5 = smov 48  }
  0xbd   : > { %v1070_v2 = vsel %vm1069_vm1, %v4157_v1, 0.0  ;;  %3068 = vmatprep.subr.bf16.mxu1 %v3691_v9  ;;  %v2941_v15 = vld [vmem:[%s4621_s24] ss:$0 sm:$0xff]  ;;  %s4623_s10 = scalar_lea.vmem %s4622_s0, %s4086_s2  ;;  %s3703_s19 = smov 40  }
  0xbe   : > { %1071 = vadd.xlane.f32.xlu0 %v1070_v2  ;;  %v2942_v17 = vld [vmem:[%s4623_s10] ss:$0 sm:$0xff]  ;;  %s3704_s17 = smov 8   ;;  %s3705_s24 = smov 16  }
  0xbf   : > { %s3706_s21 = smov 24   ;;  %s4624_s0 = sld [smem:[#allocation40_spill]] }
  0xc0   : > { %s4630_s14 = sld [smem:[#allocation41_spill]] }
  0xc5   : > { %s4625_s10 = scalar_lea.vmem %s4624_s0, %s4086_s2 }
  0xc6   : > { %s4631_s0 = scalar_lea.vmem %s4630_s14, %s4086_s2 }
 0x147   : > { %v1072_v3 = vpop.xlane.xlu0 %1071 }
 0x148   : > { %v1074_v4 = vmul.f32 0.03125, %v1072_v3 }
 0x14a   : > { %v1075_v5 = vsub.f32 %v4157_v1, %v1074_v4 }
 0x14c   : > { %v1076_v6 = vmul.f32 %v1075_v5, %v1075_v5 }
 0x14e   : > { %v1077_v7 = vsel %vm1069_vm1, %v1076_v6, 0.0 }
 0x14f   : > { %1078 = vadd.xlane.f32.xlu0 %v1077_v7 }
 0x1d8   : > { %v1079_v11 = vpop.xlane.xlu0 %1078 }
 0x1d9   : > { %v1080_v12 = vmul.f32 0.03125, %v1079_v11 }
 0x1db   : > { %v1081_v13 = vadd.f32 1e-05, %v1080_v12 }
 0x1dd   : > { %3372 = vrsqrt.f32 %v1081_v13 }
 0x1ea   : > { %v3373_v14 = vpop.eup %3372 }
 0x1eb   : > { %v1083_v16 = vmul.f32 %v3373_v14, %v1075_v5 }
 0x1ed   : > { %v1090_v18 = vmul.f32 %v2941_v15, %v1083_v16 }
 0x1ef   : > { %v1097_v19 = vadd.f32 %v2942_v17, %v1090_v18 }
 0x1f1   : > { %v1102_v20 = vpack.c.bf16 %v1097_v19, %v1097_v19 }
 0x1f3   : > { %3065 = vmatmul.mubr.msk.bf16.vlgmr.msra.gmra.mxu1 %vm1069_vm1, %v1102_v20 }
 0x1f4   : > { %3070 = vmatprep.mubr.msk.bf16.mxu1 %vm3692_vm2, %v3691_v9 }
 0x2b3   : > { %v1152_v21 = vpop.f32.mrf.mxu1 }
 0x2b4   : > { %v1158_v22 = vmul.f32 0.35355338, %v1152_v21  ;;  %v4186_v23 = vpack.c.bf16 %v1152_v21, %v1152_v21 }
 0x2b5   : > { %v3066_v24 = vpop.f32.mrf.mxu1 }
 0x2b6   : > { %v1164_v25 = vpack.c.bf16 %v1158_v22, %v1158_v22  ;;  %1167 = vrot.lane.b32.xlu1 %v4186_v23, %s3693_s28 }
 0x2b7   : > { %v1155_v26 = vpop.f32.mrf.mxu1 }
 0x2b8   : > { %1279 = vrot.lane.b32.xlu0 %v1164_v25, %s3694_s15 }
 0x2b9   : > { %v3067_v27 = vpop.f32.mrf.mxu1 }
 0x2ba   : > { %1281 = vrot.lane.b32.xlu1 %v4186_v23, %s3695_s23 }
 0x2be   : > { %1397 = vrot.lane.b32.xlu1 %v4186_v23, %s3696_s18 }
 0x2c2   : > { %1395 = vrot.lane.b32.xlu1 %v1164_v25, %s3697_s3 }
 0x2c6   : > { %1513 = vrot.lane.b32.xlu1 %v4186_v23, %s3698_s9 }
 0x2ca   : > { %1511 = vrot.lane.b32.xlu1 %v1164_v25, %s3699_s22 }
 0x328   : > { %v1168_v28 = vpop.permute.xlu1 %1167 }
 0x329   : > { %v1174_v29 = vsel %vm1169_vm3, %v1168_v28, 0 }
 0x32a   : > { %3069 = vmatpush3.bf16.xpose.msra.mxu1 %v1174_v29  ;;  %v1280_v33 = vpop.permute.xlu0 %1279 }
 0x32b   : > { %3080 = vmatprep.subr.bf16.mxu1 %v3691_v9 }
 0x32c   : > { %v1282_v30 = vpop.permute.xlu1 %1281 }
 0x32d   : > { %v1287_v31 = vsel %vm1169_vm3, %v1282_v30, 0 }
 0x330   : > { %v1398_v32 = vpop.permute.xlu1 %1397 }
 0x331   : > { %3071 = vmatmul.mubr.msk.bf16.vlgmr.msra.gmra.mxu1 %vm1169_vm3, %v1164_v25  ;;  %v1403_v35 = vsel %vm1169_vm3, %v1398_v32, 0 }
 0x332   : > { %3081 = vmatpush3.bf16.xpose.msra.mxu1 %v1287_v31  ;;  %3082 = vmatprep.mubr.msk.bf16.mxu1 %vm3692_vm2, %v3691_v9 }
 0x333   : > { %3092 = vmatprep.subr.bf16.mxu1 %v3691_v9 }
 0x334   : > { %v1396_v34 = vpop.permute.xlu1 %1395 }
 0x338   : > { %v1514_v36 = vpop.permute.xlu1 %1513 }
 0x339   : > { %3083 = vmatmul.mubr.msk.bf16.vlgmr.msra.gmra.mxu1 %vm1169_vm3, %v1280_v33  ;;  %v1519_v37 = vsel %vm1169_vm3, %v1514_v36, 0 }
 0x33a   : > { %3093 = vmatpush3.bf16.xpose.msra.mxu1 %v1403_v35  ;;  %3094 = vmatprep.mubr.msk.bf16.mxu1 %vm3692_vm2, %v3691_v9 }
 0x33b   : > { %3104 = vmatprep.subr.bf16.mxu1 %v3691_v9 }
 0x33c   : > { %v1512_v38 = vpop.permute.xlu1 %1511 }
 0x341   : > { %3095 = vmatmul.mubr.msk.bf16.vlgmr.msra.gmra.mxu1 %vm1169_vm3, %v1396_v34 }
 0x342   : > { %3105 = vmatpush3.bf16.xpose.msra.mxu1 %v1519_v37  ;;  %3106 = vmatprep.mubr.msk.bf16.mxu1 %vm3692_vm2, %v3691_v9 }
 0x343   : > { %3116 = vmatprep.subr.bf16.mxu1 %v3691_v9 }
 0x349   : > { %3107 = vmatmul.mubr.msk.bf16.vlgmr.msra.gmra.mxu1 %vm1169_vm3, %v1512_v38 }
 0x34a   : > { %3120 = vmatprep.mubr.msk.bf16.mxu1 %vm3692_vm2, %v3691_v9 }
 0x3f1   : > { %v1210_v39 = vpop.f32.mrf.mxu1 }
 0x3f2   : > { %v1216_v40 = vsel %vm1169_vm3, %v1210_v39, -inf }
 0x3f3   : > { %1217 = vmax.xlane.f32.xlu1 %v1216_v40  ;;  %v3072_v41 = vpop.f32.mrf.mxu1 }
 0x3f5   : > { %v1213_v42 = vpop.f32.mrf.mxu1 }
 0x3f7   : > { %v3073_v43 = vpop.f32.mrf.mxu1 }
 0x3f9   : > { %v1323_v44 = vpop.f32.mrf.mxu1 }
 0x3fa   : > { %v1329_v45 = vsel %vm1169_vm3, %v1323_v44, -inf }
 0x3fb   : > { %1330 = vmax.xlane.f32.xlu0 %v1329_v45  ;;  %v3084_v46 = vpop.f32.mrf.mxu1 }
 0x3fd   : > { %v1326_v47 = vpop.f32.mrf.mxu1 }
 0x3ff   : > { %v3085_v48 = vpop.f32.mrf.mxu1 }
 0x401   : > { %v1439_v49 = vpop.f32.mrf.mxu1 }
 0x402   : > { %v1445_v50 = vsel %vm1169_vm3, %v1439_v49, -inf }
 0x403   : > { %1446 = vmax.xlane.f32.xlu1 %v1445_v50  ;;  %v3096_v51 = vpop.f32.mrf.mxu1  ;;  %v3359_v50 = vld [vmem:[%s4110_s12] sm:$0xff]  }
 0x405   : > { %v1442_v52 = vpop.f32.mrf.mxu1 }
 0x407   : > { %v3097_v53 = vpop.f32.mrf.mxu1 }
 0x409   : > { %v1555_v54 = vpop.f32.mrf.mxu1 }
 0x40a   : > { %v1561_v55 = vsel %vm1169_vm3, %v1555_v54, -inf }
 0x40b   : > { %1562 = vmax.xlane.f32.xlu0 %v1561_v55  ;;  %v3108_v56 = vpop.f32.mrf.mxu1 }
 0x40d   : > { %v1558_v57 = vpop.f32.mrf.mxu1 }
 0x40f   : > { %v3109_v58 = vpop.f32.mrf.mxu1 }
 0x47c   : > { %v1218_v59 = vpop.xlane.xlu1 %1217 }
 0x47d   : > { %v1219_v60 = vsub.f32 %v1210_v39, %v1218_v59 }
 0x47f   : > { %v1220_v61 = vmul.f32 1.442695, %v1219_v60 }
 0x481   : > { %3374 = vpow2.f32 %v1220_v61 }
 0x484   : > { %v1331_v62 = vpop.xlane.xlu0 %1330 }
 0x485   : > { %v1332_v63 = vsub.f32 %v1323_v44, %v1331_v62 }
 0x487   : > { %v1333_v0 = vmul.f32 1.442695, %v1332_v63 }
 0x489   : > { %3376 = vpow2.f32 %v1333_v0  ;;  %v2954_v0 = vld [vmem:[%s4625_s10] ss:$0 sm:$0xff] }
 0x48c   : > { %v1447_v12 = vpop.xlane.xlu1 %1446 }
 0x48d   : > { %v1448_v13 = vsub.f32 %v1439_v49, %v1447_v12  ;;  %v3358_v49 = vld [vmem:[%s4110_s12 + $0x8] sm:$0xff]  }
 0x48e   : > { %v3375_v2 = vpop.eup %3374  ;;  %3117 = vmatpush3.bf16.msra.mxu1 %v3358_v49 }
 0x48f   : > { %v1222_v3 = vsel %vm1169_vm3, %v3375_v2, 0.0  ;;  %v1449_v14 = vmul.f32 1.442695, %v1448_v13  ;;  %3118 = vmatprep.subr.bf16.mxu1 %v3691_v9 }
 0x490   : > { %1223 = vadd.xlane.f32.xlu1 %v1222_v3 }
 0x492   : > { %3119 = vmatpush3.bf16.msra.mxu1 %v3359_v50 }
 0x493   : > { %3132 = vmatprep.subr.bf16.mxu1 %v3691_v9 }
 0x494   : > { %v1563_v4 = vpop.xlane.xlu0 %1562 }
 0x495   : > { %v1564_v5 = vsub.f32 %v1555_v54, %v1563_v4 }
 0x496   : > { %v3377_v6 = vpop.eup %3376 }
 0x497   : > { %v1565_v7 = vmul.f32 1.442695, %v1564_v5  ;;  %v1335_v8 = vsel %vm1169_vm3, %v3377_v6, 0.0 }
 0x498   : > { %1336 = vadd.xlane.f32.xlu0 %v1335_v8 }
 0x499   : > { %3378 = vpow2.f32 %v1565_v7 }
 0x49a   : > { %3380 = vpow2.f32 %v1449_v14 }
 0x4a1   : > { %1228 = vrot.lane.b32.xlu1 %v4186_v23, %s3700_s6  ;;  %s4626_s6 = scalar_lea.vmem [#allocation9], %s4069_s8 }
 0x4a6   : > { %v3379_v10 = vpop.eup %3378 }
 0x4a7   : > { %v1567_v11 = vsel %vm1169_vm3, %v3379_v10, 0.0  ;;  %v3381_v15 = vpop.eup %3380 }
 0x4a8   : > { %1568 = vadd.xlane.f32.xlu0 %v1567_v11  ;;  %v1451_v16 = vsel %vm1169_vm3, %v3381_v15, 0.0 }
 0x4be   : > { %1341 = vrot.lane.b32.xlu0 %v4186_v23, %s3701_s1  ;;  %s4627_s1 = smov %s4626_s6 }
 0x4c5   : > { %1452 = vadd.xlane.f32.xlu1 %v1451_v16  ;;  %v1781_v16 = vld [vmem:[%s4091_s13] sm:$0xff] }
 0x4d6   : > { %1457 = vrot.lane.b32.xlu1 %v4186_v23, %s3702_s5  ;;  %s4628_s5 = scalar_lea.vmem [#allocation7], %s4069_s8 }
 0x4da   : > { %1573 = vrot.lane.b32.xlu1 %v4186_v23, %s3703_s19  ;;  %s4629_s19 = smov %s4628_s5 }
 0x519   : > { %v1224_v17 = vpop.xlane.xlu1 %1223 }
 0x51a   : > { %3382 = vrcp.f32 %v1224_v17  ;;  %v1782_v17 = vld [vmem:[%s4091_s13 + $0x8] sm:$0xff] }
 0x51d   : > { %v1229_v18 = vpop.permute.xlu1 %1228 }
 0x51e   : > { %v1235_v19 = vsel %vm1233_vm4, %v1229_v18, 0  ;;  %v1787_v18 = vpack.c.bf16 %v1782_v17, %v1781_v16 }
 0x51f   : > { %3075 = vmatpush3.bf16.msra.mxu0 %v1235_v19  ;;  %v3362_v19 = vld [vmem:[%s4628_s5 + $0x8] sm:$0xff]  }
 0x520   : > { %3086 = vmatprep.subr.bf16.mxu0 %v3691_v9 }
 0x521   : > { %v1337_v20 = vpop.xlane.xlu0 %1336 }
 0x522   : > { %3384 = vrcp.f32 %v1337_v20  ;;  %v3363_v20 = vld [vmem:[%s4629_s19] sm:$0xff]   ;;  %s4641_s19 = sld [smem:[#allocation23_spill]] }
 0x527   : > { %v3383_v21 = vpop.eup %3382 }
 0x528   : > { %v1226_v22 = vmul.f32 %v3383_v21, %v3375_v2  ;;  %p2990_p12 = scmp.ne.s32.totalorder %s4641_s19, 1 }
 0x529   : > { %s4642_s13 = sld [smem:[#allocation53_spill]] (!%p2990_p12) }
 0x52a   : > { %v1227_v24 = vpack.c.bf16 %v1226_v22, %v1226_v22 }
 0x52c   : > { %3077 = vmatmul.mubr.msk.bf16.vlgmr.msra.gmra.mxu0 %vm1169_vm3, %v1227_v24 }
 0x52d   : > { %3088 = vmatprep.mubr.msk.bf16.mxu0 %vm3692_vm2, %v3691_v9 }
 0x52f   : > { %v3385_v23 = vpop.eup %3384 }
 0x530   : > { %v1339_v26 = vmul.f32 %v3385_v23, %v3377_v6 }
 0x531   : > { %v1569_v25 = vpop.xlane.xlu0 %1568 }
 0x532   : > { %v1340_v29 = vpack.c.bf16 %v1339_v26, %v1339_v26 }
 0x535   : > { %v1342_v27 = vpop.permute.xlu0 %1341 }
 0x536   : > { %v1347_v28 = vsel %vm1233_vm4, %v1342_v27, 0  ;;  %v2959_v27 = vld [vmem:[%s1037_s25] ss:$0 sm:$0xff]  ;;  %s4633_s25 = scalar_lea.vmem [#allocation10], %s4069_s8 }
 0x537   : > { %3087 = vmatpush3.bf16.msra.mxu0 %v1347_v28 }
 0x538   : > { %3098 = vmatprep.subr.bf16.mxu0 %v3691_v9 }
 0x53a   : > { %3089 = vmatmul.mubr.msk.bf16.vlgmr.msra.gmra.mxu0 %vm1169_vm3, %v1340_v29 }
 0x53b   : > { %3100 = vmatprep.mubr.msk.bf16.mxu0 %vm3692_vm2, %v3691_v9 }
 0x54e   : > { %v1453_v30 = vpop.xlane.xlu1 %1452 }
 0x54f   : > { %3386 = vrcp.f32 %v1453_v30 }
 0x550   : > { %3388 = vrcp.f32 %v1569_v25  ;;  %v2958_v25 = vld [vmem:[%s4631_s0] ss:$0 sm:$0xff]  ;;  %s4643_s0 = sld [smem:[#allocation54_spill]] (!%p2990_p12) }
 0x552   : > { %v1458_v31 = vpop.permute.xlu1 %1457 }
 0x553   : > { %v1463_v32 = vsel %vm1233_vm4, %v1458_v31, 0 }
 0x554   : > { %3099 = vmatpush3.bf16.msra.mxu0 %v1463_v32 }
 0x555   : > { %3110 = vmatprep.subr.bf16.mxu0 %v3691_v9 }
 0x556   : > { %v1574_v35 = vpop.permute.xlu1 %1573 }
 0x557   : > { %v1579_v38 = vsel %vm1233_vm4, %v1574_v35, 0 }
 0x55c   : > { %v3387_v33 = vpop.eup %3386 }
 0x55d   : > { %v1455_v34 = vmul.f32 %v3387_v33, %v3381_v15  ;;  %v3389_v37 = vpop.eup %3388  ;;  %v3361_v15 = vld [vmem:[%s4627_s1] sm:$0xff]  }
 0x55e   : > { %v1571_v39 = vmul.f32 %v3389_v37, %v3379_v10 }
 0x55f   : > { %v1456_v36 = vpack.c.bf16 %v1455_v34, %v1455_v34 }
 0x560   : > { %v1572_v40 = vpack.c.bf16 %v1571_v39, %v1571_v39 }
 0x561   : > { %3101 = vmatmul.mubr.msk.bf16.vlgmr.msra.gmra.mxu0 %vm1169_vm3, %v1456_v36 }
 0x562   : > { %3111 = vmatpush3.bf16.msra.mxu0 %v1579_v38  ;;  %3112 = vmatprep.mubr.msk.bf16.mxu0 %vm3692_vm2, %v3691_v9 }
 0x563   : > { %3124 = vmatprep.subr.bf16.mxu0 %v3691_v9 }
 0x569   : > { %3113 = vmatmul.mubr.msk.bf16.vlgmr.msra.gmra.mxu0 %vm1169_vm3, %v1572_v40 }
 0x56a   : > { %3128 = vmatprep.mubr.msk.bf16.mxu0 %vm3692_vm2, %v3691_v9  ;;  %3125 = vmatpush3.bf16.msra.mxu0 %v3362_v19 }
 0x56b   : > { %3126 = vmatprep.subr.bf16.mxu0 %v3691_v9 }
 0x56e   : > { %3127 = vmatpush3.bf16.msra.mxu0 %v3363_v20 }
 0x56f   : > { %3140 = vmatprep.subr.bf16.mxu0 %v3691_v9 }
 0x5ec   : > { %v1271_v41 = vpop.f32.mrf.mxu0 }
 0x5ed   : > { %1277 = vst.msk [vmem:[#allocation3] sm:$0xff] %vm1169_vm3, %v1271_v41 }
 0x5ee   : > { %v3078_v42 = vpop.f32.mrf.mxu0 }
 0x5f0   : > { %v1274_v43 = vpop.f32.mrf.mxu0 }
 0x5f2   : > { %v3079_v44 = vpop.f32.mrf.mxu0 }
 0x5fa   : > { %v1383_v45 = vpop.f32.mrf.mxu0 }
 0x5fb   : > { %1390 = vrot.lane.b32.xlu0 %v1383_v45, %s3704_s17 }
 0x5fc   : > { %v3090_v46 = vpop.f32.mrf.mxu0 }
 0x5fe   : > { %v1386_v47 = vpop.f32.mrf.mxu0 }
 0x600   : > { %v3091_v48 = vpop.f32.mrf.mxu0 }
 0x621   : > { %v1499_v51 = vpop.f32.mrf.mxu0 }
 0x622   : > { %1506 = vrot.lane.b32.xlu1 %v1499_v51, %s3705_s24 }
 0x623   : > { %v3102_v52 = vpop.f32.mrf.mxu0 }
 0x625   : > { %v1502_v53 = vpop.f32.mrf.mxu0 }
 0x627   : > { %v3103_v54 = vpop.f32.mrf.mxu0 }
 0x629   : > { %v1615_v55 = vpop.f32.mrf.mxu0 }
 0x62a   : > { %1622 = vrot.lane.b32.xlu0 %v1615_v55, %s3706_s21 }
 0x62b   : > { %v3114_v56 = vpop.f32.mrf.mxu0 }
 0x62d   : > { %v1618_v57 = vpop.f32.mrf.mxu0 }
 0x62f   : > { %v3115_v58 = vpop.f32.mrf.mxu0 }
 0x66d   : > { %v1391_v59 = vpop.permute.xlu0 %1390 }
 0x66e   : > { %1394 = vst.msk [vmem:[#allocation3] sm:$0xff] %vm1393_vm5, %v1391_v59 }
 0x694   : > { %v1507_v60 = vpop.permute.xlu1 %1506 }
 0x695   : > { %1510 = vst.msk [vmem:[#allocation3] sm:$0xff] %vm1509_vm6, %v1507_v60 }
 0x69c   : > { %v1623_v61 = vpop.permute.xlu0 %1622 }
 0x69d   : > { %1626 = vst.msk [vmem:[#allocation3] sm:$0xff] %vm1625_vm7, %v1623_v61 }
 0x6a4   : > { %v1627_v62 = vld [vmem:[#allocation3] sm:$0xff] }
 0x6a5   : > { %v1628_v63 = vpack.c.bf16 %v1627_v62, %v1627_v62 }
 0x6a7   : > { %3121 = vmatmul.mubr.msk.bf16.vlgmr.msra.gmra.mxu1 %vm1069_vm1, %v1628_v63 }
 0x6a8   : > { %3136 = vmatprep.mubr.msk.bf16.mxu1 %vm3692_vm2, %v3691_v9 }
 0x767   : > { %v1684_v2 = vpop.f32.mrf.mxu1 }
 0x768   : > { %v1685_v3 = vadd.f32 %v2954_v0, %v1684_v2 }
 0x769   : > { %v3122_v4 = vpop.f32.mrf.mxu1 }
 0x76a   : > { %v4271_v5 = vadd.f32 %v1685_v3, %v4157_v1  ;;  %v3360_v1 = vld [vmem:[%s4626_s6 + $0x8] sm:$0xff]  }
 0x76b   : > { %v1687_v6 = vpop.f32.mrf.mxu1  ;;  %3133 = vmatpush3.bf16.msra.mxu1 %v3360_v1 }
 0x76c   : > { %v1693_v7 = vsel %vm1069_vm1, %v4271_v5, 0.0  ;;  %3134 = vmatprep.subr.bf16.mxu1 %v3691_v9 }
 0x76d   : > { %1694 = vadd.xlane.f32.xlu1 %v1693_v7  ;;  %v3123_v8 = vpop.f32.mrf.mxu1 }
 0x76f   : > { %3135 = vmatpush3.bf16.msra.mxu1 %v3361_v15 }
 0x770   : > { %3146 = vmatprep.subr.bf16.mxu1 %v3691_v9 }
 0x772   : > { %3137 = vmatmul.mubr.msk.bf16.vlgmr.msra.gmra.mxu1 %vm1069_vm1, %v1787_v18 }
 0x773   : > { %3148 = vmatprep.mubr.msk.bf16.mxu1 %vm3692_vm2, %v3691_v9 }
 0x7f6   : > { %v1695_v10 = vpop.xlane.xlu1 %1694 }
 0x7f7   : > { %v1696_v11 = vmul.f32 0.03125, %v1695_v10 }
 0x7f9   : > { %v1697_v12 = vsub.f32 %v4271_v5, %v1696_v11 }
 0x7fb   : > { %v1698_v13 = vmul.f32 %v1697_v12, %v1697_v12 }
 0x7fd   : > { %v1699_v14 = vsel %vm1069_vm1, %v1698_v13, 0.0 }
 0x7fe   : > { %1700 = vadd.xlane.f32.xlu0 %v1699_v14 }
 0x832   : > { %v1837_v31 = vpop.f32.mrf.mxu1 }
 0x834   : > { %v3138_v32 = vpop.f32.mrf.mxu1 }
 0x836   : > { %v1840_v33 = vpop.f32.mrf.mxu1 }
 0x837   : > { %v4307_v34 = vpack.c.bf16 %v1840_v33, %v1837_v31 }
 0x838   : > { %v3139_v35 = vpop.f32.mrf.mxu1 }
 0x839   : > { %1961 = vrot.lane.b32.xlu0 %v4307_v34, %s3694_s15  ;;  %v1855_v36 = vsel %vm1169_vm3, %v4307_v34, 0 }
 0x887   : > { %v1701_v21 = vpop.xlane.xlu0 %1700 }
 0x888   : > { %v1702_v22 = vmul.f32 0.03125, %v1701_v21 }
 0x88a   : > { %v1703_v24 = vadd.f32 1e-05, %v1702_v22 }
 0x88c   : > { %3390 = vrsqrt.f32 %v1703_v24 }
 0x899   : > { %v3391_v23 = vpop.eup %3390 }
 0x89a   : > { %v1705_v26 = vmul.f32 %v3391_v23, %v1697_v12 }
 0x89c   : > { %v1712_v28 = vmul.f32 %v2958_v25, %v1705_v26 }
 0x89e   : > { %v1719_v29 = vadd.f32 %v2959_v27, %v1712_v28 }
 0x8a0   : > { %v1724_v30 = vpack.c.bf16 %v1719_v29, %v1719_v29 }
 0x8a2   : > { %3129 = vmatmul.mubr.msk.bf16.vlgmr.msra.gmra.mxu0 %vm1069_vm1, %v1724_v30 }
 0x8a3   : > { %3142 = vmatprep.mubr.msk.bf16.mxu0 %vm3692_vm2, %v3691_v9  ;;  %3141 = vmatpush3.bf16.xpose.msra.mxu0 %v1855_v36 }
 0x8a4   : > { %3152 = vmatprep.subr.bf16.mxu0 %v3691_v9 }
 0x8ab   : > { %v1962_v39 = vpop.permute.xlu0 %1961 }
 0x8ac   : > { %v1967_v43 = vsel %vm1169_vm3, %v1962_v39, 0 }
 0x962   : > { %v1774_v37 = vpop.f32.mrf.mxu0 }
 0x963   : > { %v1780_v38 = vmul.f32 0.35355338, %v1774_v37 }
 0x964   : > { %v3130_v40 = vpop.f32.mrf.mxu0 }
 0x965   : > { %v1849_v41 = vpack.c.bf16 %v1780_v38, %v1780_v38 }
 0x966   : > { %v1777_v42 = vpop.f32.mrf.mxu0 }
 0x967   : > { %1959 = vrot.lane.b32.xlu1 %v1849_v41, %s3694_s15  ;;  %2072 = vrot.lane.b32.xlu0 %v1849_v41, %s3697_s3 }
 0x968   : > { %3143 = vmatmul.mubr.msk.bf16.vlgmr.msra.gmra.mxu0 %vm1169_vm3, %v1849_v41  ;;  %v3131_v44 = vpop.f32.mrf.mxu0 }
 0x969   : > { %3153 = vmatpush3.bf16.xpose.msra.mxu0 %v1967_v43  ;;  %3154 = vmatprep.mubr.msk.bf16.mxu0 %vm3692_vm2, %v3691_v9 }
 0x96a   : > { %3164 = vmatprep.subr.bf16.mxu0 %v3691_v9 }
 0x96b   : > { %2074 = vrot.lane.b32.xlu1 %v4307_v34, %s3697_s3  ;;  %2185 = vrot.lane.b32.xlu0 %v1849_v41, %s3699_s22 }
 0x96f   : > { %2187 = vrot.lane.b32.xlu1 %v4307_v34, %s3699_s22 }
 0x9d9   : > { %v1960_v45 = vpop.permute.xlu1 %1959  ;;  %v2073_v49 = vpop.permute.xlu0 %2072 }
 0x9da   : > { %3155 = vmatmul.mubr.msk.bf16.vlgmr.msra.gmra.mxu0 %vm1169_vm3, %v1960_v45 }
 0x9db   : > { %3166 = vmatprep.mubr.msk.bf16.mxu0 %vm3692_vm2, %v3691_v9 }
 0x9dd   : > { %v2075_v46 = vpop.permute.xlu1 %2074  ;;  %v2186_v51 = vpop.permute.xlu0 %2185 }
 0x9de   : > { %v2080_v47 = vsel %vm1169_vm3, %v2075_v46, 0 }
 0x9df   : > { %3165 = vmatpush3.bf16.xpose.msra.mxu0 %v2080_v47 }
 0x9e0   : > { %3176 = vmatprep.subr.bf16.mxu0 %v3691_v9 }
 0x9e1   : > { %v2188_v48 = vpop.permute.xlu1 %2187 }
 0x9e2   : > { %v2193_v50 = vsel %vm1169_vm3, %v2188_v48, 0 }
 0x9e6   : > { %3167 = vmatmul.mubr.msk.bf16.vlgmr.msra.gmra.mxu0 %vm1169_vm3, %v2073_v49 }
 0x9e7   : > { %3177 = vmatpush3.bf16.xpose.msra.mxu0 %v2193_v50  ;;  %3178 = vmatprep.mubr.msk.bf16.mxu0 %vm3692_vm2, %v3691_v9 }
 0x9e8   : > { %3188 = vmatprep.subr.bf16.mxu0 %v3691_v9 }
 0x9ee   : > { %3179 = vmatmul.mubr.msk.bf16.vlgmr.msra.gmra.mxu0 %vm1169_vm3, %v2186_v51 }
 0x9ef   : > { %3192 = vmatprep.mubr.msk.bf16.mxu0 %vm3692_vm2, %v3691_v9 }
 0xa28   : > { %v1891_v52 = vpop.f32.mrf.mxu0 }
 0xa29   : > { %v1898_v53 = vsel %vm1897_vm8, %v1891_v52, -inf }
 0xa2a   : > { %1899 = vmax.xlane.f32.xlu1 %v1898_v53  ;;  %v3144_v54 = vpop.f32.mrf.mxu0 }
 0xa2c   : > { %v1894_v55 = vpop.f32.mrf.mxu0 }
 0xa2e   : > { %v3145_v56 = vpop.f32.mrf.mxu0 }
 0xa9a   : > { %v2003_v57 = vpop.f32.mrf.mxu0 }
 0xa9b   : > { %v2009_v58 = vsel %vm1897_vm8, %v2003_v57, -inf }
 0xa9c   : > { %2010 = vmax.xlane.f32.xlu0 %v2009_v58  ;;  %v3156_v59 = vpop.f32.mrf.mxu0  ;;  %v3364_v58 = vld [vmem:[%s4633_s25 + $0x8] sm:$0xff]  }
 0xa9d   : > { %3189 = vmatpush3.bf16.msra.mxu0 %v3364_v58 }
 0xa9e   : > { %v2006_v60 = vpop.f32.mrf.mxu0  ;;  %3190 = vmatprep.subr.bf16.mxu0 %v3691_v9 }
 0xaa0   : > { %v3157_v61 = vpop.f32.mrf.mxu0 }
 0xaa6   : > { %v2116_v62 = vpop.f32.mrf.mxu0 }
 0xaa7   : > { %v2122_v63 = vsel %vm1897_vm8, %v2116_v62, -inf }
 0xaa8   : > { %2123 = vmax.xlane.f32.xlu0 %v2122_v63  ;;  %v3168_v0 = vpop.f32.mrf.mxu0 }
 0xaaa   : > { %v2119_v2 = vpop.f32.mrf.mxu0 }
 0xaac   : > { %v3169_v3 = vpop.f32.mrf.mxu0 }
 0xaae   : > { %v2229_v4 = vpop.f32.mrf.mxu0 }
 0xaaf   : > { %v2235_v6 = vsel %vm1897_vm8, %v2229_v4, -inf }
 0xab0   : > { %2236 = vmax.xlane.f32.xlu1 %v2235_v6  ;;  %v3180_v7 = vpop.f32.mrf.mxu0 }
 0xab2   : > { %v2232_v8 = vpop.f32.mrf.mxu0 }
 0xab3   : > { %v1900_v10 = vpop.xlane.xlu1 %1899 }
 0xab4   : > { %v1901_v11 = vsub.f32 %v1891_v52, %v1900_v10  ;;  %v3181_v12 = vpop.f32.mrf.mxu0 }
 0xab6   : > { %v1902_v13 = vmul.f32 1.442695, %v1901_v11 }
 0xab8   : > { %3392 = vpow2.f32 %v1902_v13 }
 0xac5   : > { %v3393_v14 = vpop.eup %3392 }
 0xac6   : > { %v1904_v1 = vsel %vm1897_vm8, %v3393_v14, 0.0 }
 0xac7   : > { %1905 = vadd.xlane.f32.xlu0 %v1904_v1 }
 0xb25   : > { %v2011_v15 = vpop.xlane.xlu0 %2010 }
 0xb26   : > { %v2012_v16 = vsub.f32 %v2003_v57, %v2011_v15 }
 0xb28   : > { %v2013_v17 = vmul.f32 1.442695, %v2012_v16 }
 0xb2a   : > { %3394 = vpow2.f32 %v2013_v17 }
 0xb31   : > { %v2124_v18 = vpop.xlane.xlu0 %2123 }
 0xb32   : > { %v2125_v19 = vsub.f32 %v2116_v62, %v2124_v18 }
 0xb34   : > { %v2126_v20 = vmul.f32 1.442695, %v2125_v19 }
 0xb36   : > { %3396 = vpow2.f32 %v2126_v20 }
 0xb37   : > { %v3395_v21 = vpop.eup %3394 }
 0xb38   : > { %v2015_v22 = vsel %vm1897_vm8, %v3395_v21, 0.0 }
 0xb39   : > { %2016 = vadd.xlane.f32.xlu1 %v2015_v22  ;;  %v2237_v25 = vpop.xlane.xlu1 %2236 }
 0xb3a   : > { %v2238_v26 = vsub.f32 %v2229_v4, %v2237_v25 }
 0xb3c   : > { %v2239_v27 = vmul.f32 1.442695, %v2238_v26 }
 0xb3e   : > { %3398 = vpow2.f32 %v2239_v27 }
 0xb43   : > { %v3397_v24 = vpop.eup %3396 }
 0xb44   : > { %v2128_v23 = vsel %vm1897_vm8, %v3397_v24, 0.0 }
 0xb45   : > { %2129 = vadd.xlane.f32.xlu0 %v2128_v23  ;;  %v3366_v23 = vld [vmem:[%s879_s27 + $0x8] sm:$0xff]  }
 0xb4a   : > { %2021 = vrot.lane.b32.xlu1 %v4307_v34, %s3695_s23 }
 0xb4b   : > { %v3399_v28 = vpop.eup %3398 }
 0xb4c   : > { %v2241_v29 = vsel %vm1897_vm8, %v3399_v28, 0.0 }
 0xb50   : > { %v1906_v30 = vpop.xlane.xlu0 %1905 }
 0xb51   : > { %3400 = vrcp.f32 %v1906_v30 }
 0xb5b   : > { %1911 = vrot.lane.b32.xlu0 %v4307_v34, %s3693_s28  ;;  %s4634_s28 = smov %s4633_s25 }
 0xb5c   : > { %v3365_v60 = vld [vmem:[%s4634_s28] sm:$0xff]  }
 0xb5d   : > { %3191 = vmatpush3.bf16.msra.mxu0 %v3365_v60 }
 0xb5e   : > { %v3401_v32 = vpop.eup %3400  ;;  %3204 = vmatprep.subr.bf16.mxu0 %v3691_v9 }
 0xb5f   : > { %2247 = vrot.lane.b32.xlu0 %v4307_v34, %s3698_s9  ;;  %v1908_v35 = vmul.f32 %v3401_v32, %v3393_v14 }
 0xb61   : > { %v1909_v37 = vpack.c.bf16 %v1908_v35, %v1908_v35 }
 0xb6e   : > { %2242 = vadd.xlane.f32.xlu1 %v2241_v29  ;;  %v2978_v29 = vld [vmem:[%s1043_s29] ss:$0 sm:$0xff] }
 0xb7f   : > { %2134 = vrot.lane.b32.xlu1 %v4307_v34, %s3696_s18  ;;  %s4635_s18 = sld [smem:[#allocation46_spill]] }
 0xb85   : > { %s4636_s3 = scalar_lea.vmem %s4635_s18, %s4086_s2 }
 0xb86   : > { %v2974_v12 = vld [vmem:[%s4636_s3] ss:$0 sm:$0xff] }
 0xbc2   : > { %v2017_v31 = vpop.xlane.xlu1 %2016 }
 0xbc3   : > { %3402 = vrcp.f32 %v2017_v31  ;;  %v2979_v31 = vld [vmem:[%s1046_s26] ss:$0 sm:$0xff] }
 0xbc6   : > { %v2022_v39 = vpop.permute.xlu1 %2021 }
 0xbce   : > { %v2130_v33 = vpop.xlane.xlu0 %2129 }
 0xbcf   : > { %3404 = vrcp.f32 %v2130_v33 }
 0xbd0   : > { %v3403_v38 = vpop.eup %3402 }
 0xbd1   : > { %v2019_v34 = vmul.f32 %v3403_v38, %v3395_v21  ;;  %v3370_v38 = vld [vmem:[%s4144_s11 + $0x8] sm:$0xff]  }
 0xbd2   : > { %v1912_v36 = vpop.permute.xlu0 %1911 }
 0xbd3   : > { %3147 = vmatpush3.bf16.msra.mxu1 %v1912_v36  ;;  %v2020_v40 = vpack.c.bf16 %v2019_v34, %v2019_v34  ;;  %v3368_v36 = vld [vmem:[%s4144_s11 + $0x18] sm:$0xff]   ;;  %v2980_v34 = vld [vmem:[%s1049_s7] ss:$0 sm:$0xff] }
 0xbd4   : > { %3158 = vmatprep.subr.bf16.mxu1 %v3691_v9 }
 0xbd6   : > { %3149 = vmatmul.mubr.msk.bf16.vlgmr.msra.gmra.mxu1 %vm1897_vm8, %v1909_v37  ;;  %v2248_v46 = vpop.permute.xlu0 %2247  ;;  %v3369_v37 = vld [vmem:[%s4144_s11 + $0x10] sm:$0xff]  }
 0xbd7   : > { %3159 = vmatpush3.bf16.msra.mxu1 %v2022_v39  ;;  %3160 = vmatprep.mubr.msk.bf16.mxu1 %vm3692_vm2, %v3691_v9  ;;  %v3371_v39 = vld [vmem:[%s4144_s11] sm:$0xff]  }
 0xbd8   : > { %3170 = vmatprep.subr.bf16.mxu1 %v3691_v9 }
 0xbdc   : > { %v3405_v41 = vpop.eup %3404 }
 0xbdd   : > { %v2132_v43 = vmul.f32 %v3405_v41, %v3397_v24 }
 0xbde   : > { %3161 = vmatmul.mubr.msk.bf16.vlgmr.msra.gmra.mxu1 %vm1897_vm8, %v2020_v40 }
 0xbdf   : > { %3172 = vmatprep.mubr.msk.bf16.mxu1 %vm3692_vm2, %v3691_v9  ;;  %v2133_v45 = vpack.c.bf16 %v2132_v43, %v2132_v43 }
 0xbf7   : > { %v2243_v42 = vpop.xlane.xlu1 %2242 }
 0xbf8   : > { %3406 = vrcp.f32 %v2243_v42 }
 0xbfb   : > { %v2135_v44 = vpop.permute.xlu1 %2134 }
 0xbfc   : > { %3171 = vmatpush3.bf16.msra.mxu1 %v2135_v44 }
 0xbfd   : > { %3182 = vmatprep.subr.bf16.mxu1 %v3691_v9 }
 0xbff   : > { %3173 = vmatmul.mubr.msk.bf16.vlgmr.msra.gmra.mxu1 %vm1897_vm8, %v2133_v45 }
 0xc00   : > { %3183 = vmatpush3.bf16.msra.mxu1 %v2248_v46  ;;  %3184 = vmatprep.mubr.msk.bf16.mxu1 %vm3692_vm2, %v3691_v9 }
 0xc01   : > { %3196 = vmatprep.subr.bf16.mxu1 %v3691_v9 }
 0xc05   : > { %v3407_v47 = vpop.eup %3406 }
 0xc06   : > { %v2245_v48 = vmul.f32 %v3407_v47, %v3399_v28 }
 0xc08   : > { %v2246_v49 = vpack.c.bf16 %v2245_v48, %v2245_v48 }
 0xc0a   : > { %3185 = vmatmul.mubr.msk.bf16.vlgmr.msra.gmra.mxu1 %vm1897_vm8, %v2246_v49 }
 0xc0b   : > { %3200 = vmatprep.mubr.msk.bf16.mxu1 %vm3692_vm2, %v3691_v9  ;;  %3197 = vmatpush3.bf16.msra.mxu1 %v3366_v23 }
 0xc0c   : > { %3198 = vmatprep.subr.bf16.mxu1 %v3691_v9 }
 0xc96   : > { %v1951_v50 = vpop.f32.mrf.mxu1 }
 0xc97   : > { %1957 = vst.msk [vmem:[#allocation3] sm:$0xff] %vm1169_vm3, %v1951_v50 }
 0xc98   : > { %v3150_v51 = vpop.f32.mrf.mxu1 }
 0xc9a   : > { %v1954_v52 = vpop.f32.mrf.mxu1 }
 0xc9c   : > { %v3151_v53 = vpop.f32.mrf.mxu1 }
 0xc9e   : > { %v2061_v54 = vpop.f32.mrf.mxu1 }
 0xc9f   : > { %2068 = vrot.lane.b32.xlu1 %v2061_v54, %s3704_s17 }
 0xca0   : > { %v3162_v55 = vpop.f32.mrf.mxu1 }
 0xca1   : > { %v2989_v55 = vld [vmem:[%s1057_s16] ss:$0 sm:$0xff] }
 0xca2   : > { %v2064_v56 = vpop.f32.mrf.mxu1 }
 0xca4   : > { %v3163_v57 = vpop.f32.mrf.mxu1 }
 0xcbf   : > { %v2174_v59 = vpop.f32.mrf.mxu1 }
 0xcc0   : > { %2181 = vrot.lane.b32.xlu0 %v2174_v59, %s3705_s24 }
 0xcc1   : > { %v3174_v61 = vpop.f32.mrf.mxu1 }
 0xcc3   : > { %v2177_v62 = vpop.f32.mrf.mxu1 }
 0xcc5   : > { %v3175_v63 = vpop.f32.mrf.mxu1 }
 0xcca   : > { %v2287_v0 = vpop.f32.mrf.mxu1 }
 0xccb   : > { %2294 = vrot.lane.b32.xlu1 %v2287_v0, %s3706_s21 }
 0xccc   : > { %v3186_v2 = vpop.f32.mrf.mxu1 }
 0xcce   : > { %v2290_v3 = vpop.f32.mrf.mxu1 }
 0xcd0   : > { %v3187_v4 = vpop.f32.mrf.mxu1 }
 0xd11   : > { %v2069_v6 = vpop.permute.xlu1 %2068 }
 0xd12   : > { %2071 = vst.msk [vmem:[#allocation3] sm:$0xff] %vm1393_vm5, %v2069_v6 }
 0xd32   : > { %v2182_v7 = vpop.permute.xlu0 %2181 }
 0xd33   : > { %2184 = vst.msk [vmem:[#allocation3] sm:$0xff] %vm1509_vm6, %v2182_v7 }
 0xd3d   : > { %v2295_v8 = vpop.permute.xlu1 %2294 }
 0xd3e   : > { %2297 = vst.msk [vmem:[#allocation3] sm:$0xff] %vm1625_vm7, %v2295_v8 }
 0xd45   : > { %v2298_v10 = vld [vmem:[#allocation3] sm:$0xff] }
 0xd46   : > { %v2299_v11 = vpack.c.bf16 %v2298_v10, %v2298_v10 }
 0xd48   : > { %3193 = vmatmul.mubr.msk.bf16.vlgmr.msra.gmra.mxu0 %vm1069_vm1, %v2299_v11 }
 0xd49   : > { %3212 = vmatprep.mubr.msk.bf16.mxu0 %vm3692_vm2, %v3691_v9  ;;  %3205 = vmatpush3.bf16.msra.mxu0 %v3368_v36 }
 0xd4a   : > { %3206 = vmatprep.subr.bf16.mxu0 %v3691_v9 }
 0xd4d   : > { %3207 = vmatpush3.bf16.msra.mxu0 %v3369_v37 }
 0xd4e   : > { %3208 = vmatprep.subr.bf16.mxu0 %v3691_v9 }
 0xd51   : > { %3209 = vmatpush3.bf16.msra.mxu0 %v3370_v38 }
 0xd52   : > { %3210 = vmatprep.subr.bf16.mxu0 %v3691_v9 }
 0xd55   : > { %3211 = vmatpush3.bf16.msra.mxu0 %v3371_v39 }
 0xe08   : > { %v2355_v13 = vpop.f32.mrf.mxu0 }
 0xe09   : > { %v2356_v14 = vadd.f32 %v2974_v12, %v2355_v13 }
 0xe0a   : > { %v3194_v1 = vpop.f32.mrf.mxu0 }
 0xe0b   : > { %v2361_v15 = vadd.f32 %v2356_v14, %v4271_v5  ;;  %v3367_v5 = vld [vmem:[%s879_s27] sm:$0xff]  }
 0xe0c   : > { %v2358_v16 = vpop.f32.mrf.mxu0  ;;  %3199 = vmatpush3.bf16.msra.mxu1 %v3367_v5 }
 0xe0d   : > { %v2364_v17 = vsel %vm1069_vm1, %v2361_v15, 0.0 }
 0xe0e   : > { %2365 = vadd.xlane.f32.xlu0 %v2364_v17  ;;  %v3195_v18 = vpop.f32.mrf.mxu0 }
 0xe97   : > { %v2366_v19 = vpop.xlane.xlu0 %2365 }
 0xe98   : > { %v2367_v20 = vmul.f32 0.03125, %v2366_v19 }
 0xe9a   : > { %v2368_v21 = vsub.f32 %v2361_v15, %v2367_v20 }
 0xe9c   : > { %v2369_v22 = vmul.f32 %v2368_v21, %v2368_v21 }
 0xe9e   : > { %v2370_v24 = vsel %vm1069_vm1, %v2369_v22, 0.0 }
 0xe9f   : > { %2371 = vadd.xlane.f32.xlu1 %v2370_v24 }
 0xf28   : > { %v2372_v25 = vpop.xlane.xlu1 %2371 }
 0xf29   : > { %v2373_v26 = vmul.f32 0.03125, %v2372_v25 }
 0xf2b   : > { %v2374_v27 = vadd.f32 1e-05, %v2373_v26 }
 0xf2d   : > { %3408 = vrsqrt.f32 %v2374_v27 }
 0xf3a   : > { %v3409_v28 = vpop.eup %3408 }
 0xf3b   : > { %v2376_v30 = vmul.f32 %v3409_v28, %v2368_v21 }
 0xf3d   : > { %v2383_v32 = vmul.f32 %v2978_v29, %v2376_v30 }
 0xf3f   : > { %v2390_v33 = vadd.f32 %v2979_v31, %v2383_v32 }
 0xf41   : > { %v2395_v35 = vpack.c.bf16 %v2390_v33, %v2390_v33 }
 0xf43   : > { %3201 = vmatmul.mubr.msk.bf16.vlgmr.msra.gmra.mxu1 %vm1069_vm1, %v2395_v35 }
0x1003   : > { %v2452_v40 = vpop.f32.mrf.mxu1 }
0x1004   : > { %v2453_v41 = vadd.f32 %v2980_v34, %v2452_v40 }
0x1005   : > { %v3202_v42 = vpop.f32.mrf.mxu1 }
0x1006   : > { %v2459_v43 = vmul.f32 0.044715, %v2453_v41  ;;  %v2458_v9 = vmul.f32 0.5, %v2453_v41 }
0x1007   : > { %v2455_v44 = vpop.f32.mrf.mxu1 }
0x1008   : > { %v2460_v45 = vmul.f32 %v2459_v43, %v2453_v41 }
0x1009   : > { %v3203_v46 = vpop.f32.mrf.mxu1 }
0x100a   : > { %v2461_v47 = vmul.f32 %v2460_v45, %v2453_v41 }
0x100c   : > { %v2462_v48 = vadd.f32 %v2461_v47, %v2453_v41 }
0x100e   : > { %v2463_v49 = vmul.f32 0.7978846, %v2462_v48 }
0x1010   : > { %3410 = vtanh.f32 %v2463_v49 }
0x101d   : > { %v3411_v50 = vpop.eup %3410 }
0x101e   : > { %v2465_v51 = vadd.f32 1.0, %v3411_v50 }
0x1020   : > { %v2466_v52 = vmul.f32 %v2465_v51, %v2458_v9 }
0x1022   : > { %v2475_v53 = vpack.c.bf16 %v2466_v52, %v2466_v52 }
0x1024   : > { %3213 = vmatmul.mubr.msk.bf16.vlgmr.msra.gmra.mxu0 %vm2500_vm9, %v2475_v53 }
0x10e4   : > { %v2538_v54 = vpop.f32.mrf.mxu0 }
0x10e5   : > { %v2544_v56 = vadd.f32 %v2538_v54, %v2361_v15 }
0x10e6   : > { %v3214_v57 = vpop.f32.mrf.mxu0  ;;  %2557 = sbr.rel (%p2990_p12) target bundleno = 4640 (0x1220), region = 132 }
0x10e7   : > { %v2552_v58 = vadd.f32 %v2989_v55, %v2544_v56 }
0x10e8   : > { %v2541_v59 = vpop.f32.mrf.mxu0 }
0x10e9   : > { %2553 = vst.msk [vmem:[#allocation2] sm:$0xff] %vm1069_vm1, %v2552_v58 }
0x10ea   : > { %v3215_v60 = vpop.f32.mrf.mxu0 }
0x10eb   : > { %v2560_v61 = vsel %vm1069_vm1, %v2552_v58, 0.0  ;;  %v2991_v10 = vld [vmem:[%s4642_s13] ss:$0 sm:$0xff] }
0x10ec   : > { %2561 = vadd.xlane.f32.xlu0 %v2560_v61  ;;  %v2992_v12 = vld [vmem:[%s4643_s0] ss:$0 sm:$0xff] }
0x1175   : > { %v2562_v62 = vpop.xlane.xlu0 %2561 }
0x1176   : > { %v2563_v63 = vmul.f32 0.03125, %v2562_v62 }
0x1178   : > { %v2564_v0 = vsub.f32 %v2552_v58, %v2563_v63 }
0x117a   : > { %v2565_v2 = vmul.f32 %v2564_v0, %v2564_v0 }
0x117c   : > { %v2566_v3 = vsel %vm1069_vm1, %v2565_v2, 0.0 }
0x117d   : > { %2567 = vadd.xlane.f32.xlu0 %v2566_v3 }
0x1206   : > { %v2568_v4 = vpop.xlane.xlu0 %2567 }
0x1207   : > { %v2569_v6 = vmul.f32 0.03125, %v2568_v4 }
0x1209   : > { %v2570_v7 = vadd.f32 1e-05, %v2569_v6 }
0x120b   : > { %3412 = vrsqrt.f32 %v2570_v7 }
0x1218   : > { %v3413_v8 = vpop.eup %3412 }
0x1219   : > { %v2572_v11 = vmul.f32 %v3413_v8, %v2564_v0 }
0x121b   : > { %v2579_v13 = vmul.f32 %v2991_v10, %v2572_v11 }
0x121d   : > { %v2586_v14 = vadd.f32 %v2992_v12, %v2579_v13 }
0x121f   : > { %2587 = vst.msk [vmem:[%s4153_s30] sm:$0xff] %vm1069_vm1, %v2586_v14 }
0x1220 PF: > { %s4644_s10 = sld [smem:[#allocation24_spill]]  ;;  %s2602_s18 = sshll.u32 %s4153_s30, 4  ;;  %s2603_s18 = int_to_ptr.vmem [resolvable:$true] %s2602_s18 }
0x1221   : > { %s4645_s28 = sld [smem:[#allocation55_spill]]  ;;  %s2589_s3 = scalar_lea.sflag [#allocation6], %s4055_s20 }
0x1222   : > { %s3554_s9 = scalar_lea.vmem %s2603_s18, 128  ;;  %s3707_s22 = smov [#allocation13]  }
0x1223   : > { %p3555_p6 = scmp.ne.s32.totalorder %s2603_s18, %s3554_s9  ;;  %s3558_s17 = sshll.u32 %s3707_s22, 4  ;;  %s3559_s17 = int_to_ptr.vmem [resolvable:$false] %s3558_s17 }
0x1224   : > { %s3560_s8 = scalar_lea.vmem %s3559_s17, 256  ;;  %p3561_p5 = scmp.lt.s32.totalorder %s2603_s18, %s3559_s17 }
0x1225   : > { %p3556_p10 = pnand %p3555_p6, %p3996_p8  ;;  %p3562_p1 = scmp.lt.s32.totalorder %s3560_s8, %s3554_s9 }
0x1226   : > { %s2994_s6 = sshll.u32 %s4644_s10, 7 }
0x1227   : > { %s4646_s15 = smov %s4645_s28  ;;  %s2600_s23 = scalar_lea.hbm %s4645_s28, %s2994_s6 }
0x1228   : > { %p3557_p2 = pneg %p3556_p10  ;;  %p3563_p7 = por %p3562_p1, %p3561_p5 }
0x122a   : > { %p3564_p9 = pnand %p3563_p7, %p3557_p2 }
0x122c   : > { %3567 = shalt.err (!%p3564_p9)
}
0x122d   : > { %s3568_s24 = scalar_lea.hbm %s2600_s23, 128  ;;  %s3572_s27 = scalar_lea.hbm %s4646_s15, 256 }
0x122e   : > { %p3569_p13 = scmp.ne.s32.totalorder %s2600_s23, %s3568_s24  ;;  %p3573_p3 = scmp.lt.s32.totalorder %s2600_s23, %s4646_s15 }
0x122f   : > { %p3574_p11 = scmp.lt.s32.totalorder %s3572_s27, %s3568_s24 }
0x1230   : > { %p3570_p0 = pnand %p3569_p13, %p3996_p8 }
0x1231   : > { %p3575_p12 = por %p3574_p11, %p3573_p3 }
0x1232   : > { %p3571_p4 = pneg %p3570_p0 }
0x1234   : > { %p3576_p6 = pnand %p3575_p12, %p3571_p4 }
0x1236   : > { %3579 = shalt.err (!%p3576_p6)
}
0x1237   : > { %3226 = dma.vmem_to_hbm [thread:$0]  (%p3996_p8), %s2603_s18, 128, %s2600_s23, %s2589_s3  }
0x1238 PF: > { %s4647_s21 = sld [smem:[#allocation27_spill]] }
0x1239   : > { %s4648_s7 = sld [smem:[#allocation20_spill]] }
0x123a   : > { %s4649_s11 = sld [smem:[#allocation33_spill]] }
0x123e   : > { %p3249_p10 = scmp.ge.s32.totalorder %s4647_s21, 2 }
0x123f   : > { %s2614_s5 = sand.u32 1, %s4648_s7  }
0x1240   : > { %p4650_p2 = scmp.ne.s32.totalorder %s4649_s11, 0  ;;  %s2615_s19 = scalar_lea.sflag [#allocation6], %s2614_s5 }
0x1242   : > { %p3245_p5 = pnand %p3249_p10, %p4650_p2 }
0x1244   : > { %p3246_p1 = pneg %p3245_p5 }
0x1246   : > { %3637 = dma.done.wait (%p3246_p1), %s2615_s19, 128  }
0x1247   : > { %3639 = vsyncadd (%p3246_p1), %s2615_s19, 4294967168  ;;  %s43_s5 = sadd.s32 1, %s4647_s21   ;;  %s4651_s2 = sld [smem:[#allocation18_spill]] }
0x1248   : > { %p40_p7 = scmp.ge.s32.totalorder %s43_s5, 6   ;;  %s4652_s25 = sld [smem:[#allocation19_spill]] }
0x1249   : > { %s4653_s26 = sld [smem:[#allocation31_spill]] }
0x124a   : > { %s4654_s27 = sld [smem:[#allocation21_spill]] }
0x124b   : > { %s4655_s3 = sld [smem:[#allocation22_spill]] }
0x124c   : > { %s4656_s28 = sld [smem:[#allocation32_spill]]  ;;  %42 = sbr.rel (!%p40_p7) target bundleno = 36 (0x24), region = 247 }
0x124d   : > { %s4657_s29 = sld [smem:[#allocation25_spill]] }
0x124e   : > { %s4658_s0 = sld [smem:[#allocation26_spill]] }
0x124f   : > { %s4659_s4 = sld [smem:[#allocation28_spill]] }
0x1250   : > { %s4660_s30 = sld [smem:[#allocation29_spill]] }
0x1251   :  { %2620 = vsyncpa [#allocation5], 1 }
0x1252   :  { %2622 = vsyncpa [#allocation5 + $0x1], 1 }
0x1253   :  { %2623 = vsyncpa [#allocation8], 1 }
0x1254   :  { %2625 = vsyncpa [#allocation8 + $0x1], 1 }
0x1255   :  { %2626 = vsyncpa [#allocation11], 1 }
0x1256   :  { %2628 = vsyncpa [#allocation11 + $0x1], 1 }
0x1257   :  { %2629 = vsyncpa [#allocation6], 1 }
0x1258   :  { %2631 = vsyncpa [#allocation6 + $0x1], 1 }

</bundles_post_ra>
